<compile_context>
chip_gen: v7x
topology: tpu7x:2x2x1
jax: 0.10.0
libtpu: 0.0.40
codegen_flags: <defaults>
</compile_context>

<pallas_src>
import functools
import math

import jax
import jax.numpy as jnp
from jax.experimental import pallas as pl
from jax.experimental.pallas import tpu as pltpu  # noqa: F401  (TPU backend)

# ----------------------------- model dims -----------------------------------
B = 2          # batch
C = 4          # image channels
H = W = 16     # image spatial
PATCH = 8      # patch size -> 2x2 = 4 patches per image
VDIM = 128     # vision embed dim
HID = 128      # decoder hidden dim
NUM_HEADS = 4  # decoder heads (head_dim = 32)
SEQ = 8        # prompt length (token ids)
VOCAB = 512    # vocab size
MLP_DIM = 4 * HID
HEAD_DIM = HID // NUM_HEADS
NUM_PATCHES = (H // PATCH) * (W // PATCH)
T_TOTAL = NUM_PATCHES + SEQ          # 12 real positions
T_PAD = 16                           # padded to the bf16 (16, 128) tile


# ----------------------------- in-kernel helpers -----------------------------
def _ln(x, g, b):
    """LayerNorm over the last dim, math in f32. g/b are (1, D)."""
    x = x.astype(jnp.float32)
    mu = jnp.mean(x, axis=-1, keepdims=True)
    var = jnp.mean(jnp.square(x - mu), axis=-1, keepdims=True)
    return (x - mu) * jax.lax.rsqrt(var + 1e-5) * g + b


# ----------------------------- fused vision kernel ---------------------------
def _vision_kernel(p_ref, wp_ref, bp_ref, lg_ref, lb_ref,
                   w1_ref, b1_ref, w2_ref, b2_ref, o_ref):
    # patch-embed matmul (== stride-PATCH conv) + LN + 2-layer GELU projector,
    # all activations kept in VMEM/vregs.
    x = p_ref[...]                                                   # (M, K) bf16
    v = jnp.dot(x, wp_ref[...], preferred_element_type=jnp.float32) + bp_ref[...]
    v = _ln(v, lg_ref[...], lb_ref[...]).astype(jnp.bfloat16)
    h = jnp.dot(v, w1_ref[...], preferred_element_type=jnp.float32) + b1_ref[...]
    h = jax.nn.gelu(h, approximate=True).astype(jnp.bfloat16)
    out = jnp.dot(h, w2_ref[...], preferred_element_type=jnp.float32) + b2_ref[...]
    o_ref[...] = out.astype(o_ref.dtype)


def vision_encode(patches, params):
    """patches: [B*NP, C*P*P] bf16 -> image tokens [B*NP, HID] bf16."""
    M, _ = patches.shape
    # Grid-less launch: whole arrays resident in VMEM, no pipeline machinery.
    return pl.pallas_call(
        _vision_kernel,
        out_shape=jax.ShapeDtypeStruct((M, HID), jnp.bfloat16),
    )(patches, params["w_patch"], params["b_patch"],
      params["ln_v_g"], params["ln_v_b"],
      params["w_proj1"], params["b_proj1"],
      params["w_proj2"], params["b_proj2"])


# ----------------------------- fused decoder kernel --------------------------
def _decoder_kernel(x_ref,
                    ln1g_ref, ln1b_ref,
                    wqkv_ref, wo_ref,
                    ln2g_ref, ln2b_ref,
                    wm1_ref, bm1_ref, wm2_ref, bm2_ref,
                    lnfg_ref, lnfb_ref,
                    wlm_ref, blm_ref,
                    logits_ref, *, num_heads):
    xb = x_ref[...]                                     # (B, Tp, D) bf16
    Bn, Tp, D = xb.shape
    hd = D // num_heads
    M = Bn * Tp
    scale = 1.0 / math.sqrt(hd)

    # residual stream kept flat (M, D) in f32; batch folded into rows for all
    # dense (lane-dense) matmuls.
    x = xb.reshape(M, D).astype(jnp.float32)

    # ---------------- pre-LN + fused QKV projection (one matmul) -------------
    h1 = _ln(x, ln1g_ref[...], ln1b_ref[...]).astype(jnp.bfloat16)   # (M, D)
    qkv = jnp.dot(h1, wqkv_ref[...],
                  preferred_element_type=jnp.float32)                # (M, 3D)
    qkv = qkv.astype(jnp.bfloat16).reshape(Bn, Tp, 3 * D)
    q = qkv[..., :D]                                                 # (B, Tp, D)
    k = qkv[..., D:2 * D]
    v = qkv[..., 2 * D:]

    # prefix-causal mask built in-kernel (no HBM mask input); pad rows/cols at
    # the end are inert for the real positions.
    row = jax.lax.broadcasted_iota(jnp.int32, (Tp, Tp), 0)
    col = jax.lax.broadcasted_iota(jnp.int32, (Tp, Tp), 1)
    bias = jnp.where(col <= row, 0.0, -1e30).astype(jnp.float32)     # (Tp, Tp)

    # ---------------- attention core (per-head, batched over B) --------------
    # Scores / PV are inherently per-head (K = head_dim = 32); only the
    # projections benefit from fusion, which is done above / below.
    outs = []
    for h in range(num_heads):
        sl = slice(h * hd, (h + 1) * hd)
        s = jnp.einsum('bqd,bkd->bqk', q[..., sl], k[..., sl],
                       preferred_element_type=jnp.float32) * scale   # (B, Tp, Tp)
        s = s + bias[None, :, :]
        s = s - jnp.max(s, axis=-1, keepdims=True)
        p = jnp.exp(s)
        p = p * pl.reciprocal(jnp.sum(p, axis=-1, keepdims=True), approx=True)
        outs.append(jnp.einsum('bqk,bkd->bqd', p.astype(jnp.bfloat16),
                               v[..., sl],
                               preferred_element_type=jnp.float32))  # (B, Tp, hd)

    # head-major concat -> single lane-dense output projection + residual
    o = jnp.concatenate(outs, axis=-1).reshape(M, D)                 # (M, D) f32
    attn = jnp.dot(o.astype(jnp.bfloat16), wo_ref[...],
                   preferred_element_type=jnp.float32)               # (M, D)
    x = x + attn

    # ---------------- pre-LN MLP ----------------
    h2 = _ln(x, ln2g_ref[...], ln2b_ref[...]).astype(jnp.bfloat16)
    m = jnp.dot(h2, wm1_ref[...], preferred_element_type=jnp.float32) + bm1_ref[...]
    m = jax.nn.gelu(m, approximate=True).astype(jnp.bfloat16)
    m = jnp.dot(m, wm2_ref[...], preferred_element_type=jnp.float32) + bm2_ref[...]
    x = x + m

    # ---------------- final LN + LM head ----------------
    hf = _ln(x, lnfg_ref[...], lnfb_ref[...]).astype(jnp.bfloat16)
    logits = jnp.dot(hf, wlm_ref[...],
                     preferred_element_type=jnp.float32) + blm_ref[...]
    logits_ref[...] = logits.reshape(Bn, Tp, -1).astype(logits_ref.dtype)


def decoder_forward(seq, params):
    """seq: [B, T_pad, HID] bf16 -> logits [B, T_pad, VOCAB] f32 (fully fused)."""
    Bb, Tp, D = seq.shape
    # fused QKV weight (pure layout, host-side / folded by XLA)
    w_qkv = jnp.concatenate([params["wq"], params["wk"], params["wv"]], axis=1)

    kernel = functools.partial(_decoder_kernel, num_heads=NUM_HEADS)
    # Grid-less launch (single invocation); B is folded into M inside the
    # kernel, so no batch grid / pipeline overhead on 1-TC chips.
    return pl.pallas_call(
        kernel,
        out_shape=jax.ShapeDtypeStruct((Bb, Tp, VOCAB), jnp.float32),
    )(seq,
      params["ln1_g"], params["ln1_b"],
      w_qkv, params["wo"],
      params["ln2_g"], params["ln2_b"],
      params["w_mlp1"], params["b_mlp1"],
      params["w_mlp2"], params["b_mlp2"],
      params["lnf_g"], params["lnf_b"],
      params["w_lm"], params["b_lm"])


# ----------------------------- parameters ------------------------------------
def init_params(key):
    patch_dim = C * PATCH * PATCH
    ks = jax.random.split(key, 16)

    def w(k, shape, scale=None):
        scale = scale if scale is not None else 1.0 / math.sqrt(shape[0])
        return (jax.random.normal(k, shape, jnp.float32) * scale).astype(jnp.bfloat16)

    def zeros(n):
        return jnp.zeros((1, n), jnp.float32)

    def ones(n):
        return jnp.ones((1, n), jnp.float32)

    return {
        # vision patch embedding (== stride-PATCH conv)
        "w_patch": w(ks[0], (patch_dim, VDIM)),
        "b_patch": zeros(VDIM),
        "ln_v_g": ones(VDIM), "ln_v_b": zeros(VDIM),
        # multimodal projector (2-layer MLP, GELU)
        "w_proj1": w(ks[1], (VDIM, HID)), "b_proj1": zeros(HID),
        "w_proj2": w(ks[2], (HID, HID)), "b_proj2": zeros(HID),
        # text embedding table
        "embed": w(ks[3], (VOCAB, HID), scale=0.02),
        # decoder block
        "ln1_g": ones(HID), "ln1_b": zeros(HID),
        "wq": w(ks[4], (HID, HID)),
        "wk": w(ks[5], (HID, HID)),
        "wv": w(ks[6], (HID, HID)),
        "wo": w(ks[7], (HID, HID)),
        "ln2_g": ones(HID), "ln2_b": zeros(HID),
        "w_mlp1": w(ks[8], (HID, MLP_DIM)), "b_mlp1": zeros(MLP_DIM),
        "w_mlp2": w(ks[9], (MLP_DIM, HID)), "b_mlp2": zeros(HID),
        # final norm + LM head
        "lnf_g": ones(HID), "lnf_b": zeros(HID),
        "w_lm": w(ks[10], (HID, VOCAB)), "b_lm": zeros(VOCAB),
    }


# ----------------------------- forward ----------------------------------------
@jax.jit
def llava_forward(image, prompt_ids, params):
    """image: [B, C, H, W] (NCHW), prompt_ids: [B, SEQ] int32."""
    nph, npw = H // PATCH, W // PATCH
    patch_dim = C * PATCH * PATCH

    # NCHW -> [B*num_patches, C*P*P]   (glue: pure layout, outside kernels)
    patches = image.reshape(B, C, nph, PATCH, npw, PATCH)
    patches = patches.transpose(0, 2, 4, 1, 3, 5).reshape(
        B * NUM_PATCHES, patch_dim).astype(jnp.bfloat16)

    # fused vision encoder + multimodal projector -> image tokens
    img_tok = vision_encode(patches, params).reshape(B, NUM_PATCHES, HID)

    # text embedding lookup (glue) and token concat (image prefix + prompt)
    txt = params["embed"][prompt_ids]                     # [B, SEQ, HID] bf16
    seq = jnp.concatenate([img_tok, txt], axis=1)         # [B, T_TOTAL, HID]
    # pad to the (16, 128) bf16 tile; pad rows are masked out by causality
    seq = jnp.pad(seq, ((0, 0), (0, T_PAD - T_TOTAL), (0, 0)))

    # fused decoder block (LN -> MHA -> res -> LN -> MLP -> res -> LN -> LM head)
    logits_full = decoder_forward(seq, params)            # [B, T_PAD, VOCAB] f32
    logits = logits_full[:, :T_TOTAL, :]                  # drop pad positions
    next_token = jnp.argmax(logits[:, -1, :], axis=-1)    # greedy one-step decode
    return logits, next_token


# ----------------------------- main -------------------------------------------
if __name__ == "__main__":
    key = jax.random.PRNGKey(0)
    k_img, k_ids, k_par = jax.random.split(key, 3)

    image = jax.random.normal(k_img, (B, C, H, W), jnp.float32)      # NCHW
    prompt_ids = jax.random.randint(k_ids, (B, SEQ), 0, VOCAB, jnp.int32)
    params = init_params(k_par)

    logits, next_token = llava_forward(image, prompt_ids, params)
    jax.block_until_ready((logits, next_token))

    assert logits.shape == (B, T_TOTAL, VOCAB), logits.shape
    assert next_token.shape == (B,), next_token.shape
    assert bool(jnp.all(jnp.isfinite(logits)))
    print("KERNEL_OK")
</pallas_src>

<mosaic_0001>
module attributes {stable_mosaic.version = 11 : i64} {
  func.func @_vision_kernel(%arg0: memref<8x256xbf16, #tpu.memory_space<vmem>>, %arg1: memref<256x128xbf16, #tpu.memory_space<vmem>>, %arg2: memref<1x128xf32, #tpu.memory_space<vmem>>, %arg3: memref<1x128xf32, #tpu.memory_space<vmem>>, %arg4: memref<1x128xf32, #tpu.memory_space<vmem>>, %arg5: memref<128x128xbf16, #tpu.memory_space<vmem>>, %arg6: memref<1x128xf32, #tpu.memory_space<vmem>>, %arg7: memref<128x128xbf16, #tpu.memory_space<vmem>>, %arg8: memref<1x128xf32, #tpu.memory_space<vmem>>, %arg9: memref<8x128xbf16, #tpu.memory_space<vmem>>) attributes {dimension_semantics = [], scalar_prefetch = 0 : i64, scratch_operands = 0 : i64, tpu.core_type = #tpu.core_type<tc>} {
    %c0 = arith.constant 0 : index
    %c0_0 = arith.constant 0 : index
    %0 = vector.load %arg0[%c0, %c0_0] : memref<8x256xbf16, #tpu.memory_space<vmem>>, vector<8x256xbf16>
    %c0_1 = arith.constant 0 : index
    %c0_2 = arith.constant 0 : index
    %1 = vector.load %arg1[%c0_1, %c0_2] : memref<256x128xbf16, #tpu.memory_space<vmem>>, vector<256x128xbf16>
    %cst = arith.constant dense<0.000000e+00> : vector<8x128xf32>
    %2 = tpu.matmul %0, %1, %cst {dimension_numbers = #tpu.dot_dimension_numbers<[1], [0], [0], [1], [0, 0, 1, 1], [], []>} : vector<8x256xbf16>, vector<256x128xbf16>, vector<8x128xf32> -> vector<8x128xf32>
    %c0_3 = arith.constant 0 : index
    %c0_4 = arith.constant 0 : index
    %3 = vector.load %arg2[%c0_3, %c0_4] : memref<1x128xf32, #tpu.memory_space<vmem>>, vector<1x128xf32>
    %4 = vector.broadcast %3 : vector<1x128xf32> to vector<8x128xf32>
    %5 = arith.addf %2, %4 : vector<8x128xf32>
    %c0_5 = arith.constant 0 : index
    %c0_6 = arith.constant 0 : index
    %6 = vector.load %arg3[%c0_5, %c0_6] : memref<1x128xf32, #tpu.memory_space<vmem>>, vector<1x128xf32>
    %c0_7 = arith.constant 0 : index
    %c0_8 = arith.constant 0 : index
    %7 = vector.load %arg4[%c0_7, %c0_8] : memref<1x128xf32, #tpu.memory_space<vmem>>, vector<1x128xf32>
    %cst_9 = arith.constant dense<0.000000e+00> : vector<8xf32>
    %8 = vector.multi_reduction <add>, %5, %cst_9 [1] : vector<8x128xf32> to vector<8xf32>
    %9 = vector.shape_cast %8 : vector<8xf32> to vector<8x1xf32>
    %cst_10 = arith.constant 1.280000e+02 : f32
    %10 = vector.broadcast %cst_10 : f32 to vector<8x1xf32>
    %11 = arith.divf %9, %10 : vector<8x1xf32>
    %12 = vector.broadcast %11 : vector<8x1xf32> to vector<8x128xf32>
    %13 = arith.subf %5, %12 : vector<8x128xf32>
    %14 = arith.mulf %13, %13 : vector<8x128xf32>
    %cst_11 = arith.constant dense<0.000000e+00> : vector<8xf32>
    %15 = vector.multi_reduction <add>, %14, %cst_11 [1] : vector<8x128xf32> to vector<8xf32>
    %16 = vector.shape_cast %15 : vector<8xf32> to vector<8x1xf32>
    %cst_12 = arith.constant 1.280000e+02 : f32
    %17 = vector.broadcast %cst_12 : f32 to vector<8x1xf32>
    %18 = arith.divf %16, %17 : vector<8x1xf32>
    %19 = vector.broadcast %11 : vector<8x1xf32> to vector<8x128xf32>
    %20 = arith.subf %5, %19 : vector<8x128xf32>
    %cst_13 = arith.constant 9.99999974E-6 : f32
    %21 = vector.broadcast %cst_13 : f32 to vector<8x1xf32>
    %22 = arith.addf %18, %21 : vector<8x1xf32>
    %23 = math.rsqrt %22 : vector<8x1xf32>
    %24 = vector.broadcast %23 : vector<8x1xf32> to vector<8x128xf32>
    %25 = arith.mulf %20, %24 : vector<8x128xf32>
    %26 = vector.broadcast %6 : vector<1x128xf32> to vector<8x128xf32>
    %27 = arith.mulf %25, %26 : vector<8x128xf32>
    %28 = vector.broadcast %7 : vector<1x128xf32> to vector<8x128xf32>
    %29 = arith.addf %27, %28 : vector<8x128xf32>
    %30 = arith.truncf %29 : vector<8x128xf32> to vector<8x128xbf16>
    %c0_14 = arith.constant 0 : index
    %c0_15 = arith.constant 0 : index
    %31 = vector.load %arg5[%c0_14, %c0_15] : memref<128x128xbf16, #tpu.memory_space<vmem>>, vector<128x128xbf16>
    %cst_16 = arith.constant dense<0.000000e+00> : vector<8x128xf32>
    %32 = tpu.matmul %30, %31, %cst_16 {dimension_numbers = #tpu.dot_dimension_numbers<[1], [0], [0], [1], [0, 0, 1, 1], [], []>} : vector<8x128xbf16>, vector<128x128xbf16>, vector<8x128xf32> -> vector<8x128xf32>
    %c0_17 = arith.constant 0 : index
    %c0_18 = arith.constant 0 : index
    %33 = vector.load %arg6[%c0_17, %c0_18] : memref<1x128xf32, #tpu.memory_space<vmem>>, vector<1x128xf32>
    %34 = vector.broadcast %33 : vector<1x128xf32> to vector<8x128xf32>
    %35 = arith.addf %32, %34 : vector<8x128xf32>
    %36 = arith.mulf %35, %35 : vector<8x128xf32>
    %37 = arith.mulf %35, %36 : vector<8x128xf32>
    %cst_19 = arith.constant 4.471500e-02 : f32
    %38 = vector.broadcast %cst_19 : f32 to vector<8x128xf32>
    %39 = arith.mulf %38, %37 : vector<8x128xf32>
    %40 = arith.addf %35, %39 : vector<8x128xf32>
    %cst_20 = arith.constant 0.797884583 : f32
    %41 = vector.broadcast %cst_20 : f32 to vector<8x128xf32>
    %42 = arith.mulf %41, %40 : vector<8x128xf32>
    %43 = math.tanh %42 : vector<8x128xf32>
    %cst_21 = arith.constant 1.000000e+00 : f32
    %44 = vector.broadcast %cst_21 : f32 to vector<8x128xf32>
    %45 = arith.addf %44, %43 : vector<8x128xf32>
    %cst_22 = arith.constant 5.000000e-01 : f32
    %46 = vector.broadcast %cst_22 : f32 to vector<8x128xf32>
    %47 = arith.mulf %46, %45 : vector<8x128xf32>
    %48 = arith.mulf %35, %47 : vector<8x128xf32>
    %49 = arith.truncf %48 : vector<8x128xf32> to vector<8x128xbf16>
    %c0_23 = arith.constant 0 : index
    %c0_24 = arith.constant 0 : index
    %50 = vector.load %arg7[%c0_23, %c0_24] : memref<128x128xbf16, #tpu.memory_space<vmem>>, vector<128x128xbf16>
    %cst_25 = arith.constant dense<0.000000e+00> : vector<8x128xf32>
    %51 = tpu.matmul %49, %50, %cst_25 {dimension_numbers = #tpu.dot_dimension_numbers<[1], [0], [0], [1], [0, 0, 1, 1], [], []>} : vector<8x128xbf16>, vector<128x128xbf16>, vector<8x128xf32> -> vector<8x128xf32>
    %c0_26 = arith.constant 0 : index
    %c0_27 = arith.constant 0 : index
    %52 = vector.load %arg8[%c0_26, %c0_27] : memref<1x128xf32, #tpu.memory_space<vmem>>, vector<1x128xf32>
    %53 = vector.broadcast %52 : vector<1x128xf32> to vector<8x128xf32>
    %54 = arith.addf %51, %53 : vector<8x128xf32>
    %55 = arith.truncf %54 : vector<8x128xf32> to vector<8x128xbf16>
    %c0_28 = arith.constant 0 : index
    %c0_29 = arith.constant 0 : index
    %56 = vector.load %arg9[%c0_28, %c0_29] : memref<8x128xbf16, #tpu.memory_space<vmem>>, vector<8x128xbf16>
    tpu.vector_store %arg9[%c0_28, %c0_29], %55 {strides = array<i32>} : memref<8x128xbf16, #tpu.memory_space<vmem>>, vector<8x128xbf16>,
    return
  }
}

module attributes {stable_mosaic.version = 11 : i64} {
  func.func @_decoder_kernel(%arg0: memref<2x16x128xbf16, #tpu.memory_space<vmem>>, %arg1: memref<1x128xf32, #tpu.memory_space<vmem>>, %arg2: memref<1x128xf32, #tpu.memory_space<vmem>>, %arg3: memref<128x384xbf16, #tpu.memory_space<vmem>>, %arg4: memref<128x128xbf16, #tpu.memory_space<vmem>>, %arg5: memref<1x128xf32, #tpu.memory_space<vmem>>, %arg6: memref<1x128xf32, #tpu.memory_space<vmem>>, %arg7: memref<128x512xbf16, #tpu.memory_space<vmem>>, %arg8: memref<1x512xf32, #tpu.memory_space<vmem>>, %arg9: memref<512x128xbf16, #tpu.memory_space<vmem>>, %arg10: memref<1x128xf32, #tpu.memory_space<vmem>>, %arg11: memref<1x128xf32, #tpu.memory_space<vmem>>, %arg12: memref<1x128xf32, #tpu.memory_space<vmem>>, %arg13: memref<128x512xbf16, #tpu.memory_space<vmem>>, %arg14: memref<1x512xf32, #tpu.memory_space<vmem>>, %arg15: memref<2x16x512xf32, #tpu.memory_space<vmem>>) attributes {dimension_semantics = [], scalar_prefetch = 0 : i64, scratch_operands = 0 : i64, tpu.core_type = #tpu.core_type<tc>} {
    %c0 = arith.constant 0 : index
    %c0_0 = arith.constant 0 : index
    %c0_1 = arith.constant 0 : index
    %0 = vector.load %arg0[%c0, %c0_0, %c0_1] : memref<2x16x128xbf16, #tpu.memory_space<vmem>>, vector<2x16x128xbf16>
    %1 = vector.shape_cast %0 : vector<2x16x128xbf16> to vector<32x128xbf16>
    %2 = arith.extf %1 : vector<32x128xbf16> to vector<32x128xf32>
    %c0_2 = arith.constant 0 : index
    %c0_3 = arith.constant 0 : index
    %3 = vector.load %arg1[%c0_2, %c0_3] : memref<1x128xf32, #tpu.memory_space<vmem>>, vector<1x128xf32>
    %c0_4 = arith.constant 0 : index
    %c0_5 = arith.constant 0 : index
    %4 = vector.load %arg2[%c0_4, %c0_5] : memref<1x128xf32, #tpu.memory_space<vmem>>, vector<1x128xf32>
    %cst = arith.constant dense<0.000000e+00> : vector<32xf32>
    %5 = vector.multi_reduction <add>, %2, %cst [1] : vector<32x128xf32> to vector<32xf32>
    %6 = vector.shape_cast %5 : vector<32xf32> to vector<32x1xf32>
    %cst_6 = arith.constant 1.280000e+02 : f32
    %7 = vector.broadcast %cst_6 : f32 to vector<32x1xf32>
    %8 = arith.divf %6, %7 : vector<32x1xf32>
    %9 = vector.broadcast %8 : vector<32x1xf32> to vector<32x128xf32>
    %10 = arith.subf %2, %9 : vector<32x128xf32>
    %11 = arith.mulf %10, %10 : vector<32x128xf32>
    %cst_7 = arith.constant dense<0.000000e+00> : vector<32xf32>
    %12 = vector.multi_reduction <add>, %11, %cst_7 [1] : vector<32x128xf32> to vector<32xf32>
    %13 = vector.shape_cast %12 : vector<32xf32> to vector<32x1xf32>
    %cst_8 = arith.constant 1.280000e+02 : f32
    %14 = vector.broadcast %cst_8 : f32 to vector<32x1xf32>
    %15 = arith.divf %13, %14 : vector<32x1xf32>
    %16 = vector.broadcast %8 : vector<32x1xf32> to vector<32x128xf32>
    %17 = arith.subf %2, %16 : vector<32x128xf32>
    %cst_9 = arith.constant 9.99999974E-6 : f32
    %18 = vector.broadcast %cst_9 : f32 to vector<32x1xf32>
    %19 = arith.addf %15, %18 : vector<32x1xf32>
    %20 = math.rsqrt %19 : vector<32x1xf32>
    %21 = vector.broadcast %20 : vector<32x1xf32> to vector<32x128xf32>
    %22 = arith.mulf %17, %21 : vector<32x128xf32>
    %23 = vector.broadcast %3 : vector<1x128xf32> to vector<32x128xf32>
    %24 = arith.mulf %22, %23 : vector<32x128xf32>
    %25 = vector.broadcast %4 : vector<1x128xf32> to vector<32x128xf32>
    %26 = arith.addf %24, %25 : vector<32x128xf32>
    %27 = arith.truncf %26 : vector<32x128xf32> to vector<32x128xbf16>
    %c0_10 = arith.constant 0 : index
    %c0_11 = arith.constant 0 : index
    %28 = vector.load %arg3[%c0_10, %c0_11] : memref<128x384xbf16, #tpu.memory_space<vmem>>, vector<128x384xbf16>
    %cst_12 = arith.constant dense<0.000000e+00> : vector<32x384xf32>
    %29 = tpu.matmul %27, %28, %cst_12 {dimension_numbers = #tpu.dot_dimension_numbers<[1], [0], [0], [1], [0, 0, 1, 1], [], []>} : vector<32x128xbf16>, vector<128x384xbf16>, vector<32x384xf32> -> vector<32x384xf32>
    %30 = arith.truncf %29 : vector<32x384xf32> to vector<32x384xbf16>
    %31 = vector.shape_cast %30 : vector<32x384xbf16> to vector<2x16x384xbf16>
    %32 = vector.extract_strided_slice %31 {offsets = [0, 0, 0], sizes = [2, 16, 128], strides = [1, 1, 1]} : vector<2x16x384xbf16> to vector<2x16x128xbf16>
    %33 = vector.extract_strided_slice %31 {offsets = [0, 0, 128], sizes = [2, 16, 128], strides = [1, 1, 1]} : vector<2x16x384xbf16> to vector<2x16x128xbf16>
    %34 = vector.extract_strided_slice %31 {offsets = [0, 0, 256], sizes = [2, 16, 128], strides = [1, 1, 1]} : vector<2x16x384xbf16> to vector<2x16x128xbf16>
    %35 = tpu.iota {dimensions = array<i32: 0>} : vector<16x16xi32>
    %36 = tpu.iota {dimensions = array<i32: 1>} : vector<16x16xi32>
    %37 = arith.cmpi sle, %36, %35 : vector<16x16xi32>
    %cst_13 = arith.constant 0.000000e+00 : f32
    %cst_14 = arith.constant -1.000000e+30 : f32
    %38 = vector.broadcast %cst_13 : f32 to vector<16x16xf32>
    %39 = vector.broadcast %cst_14 : f32 to vector<16x16xf32>
    %40 = arith.select %37, %38, %39 : vector<16x16xi1>, vector<16x16xf32>
    %41 = vector.extract_strided_slice %32 {offsets = [0, 0, 0], sizes = [2, 16, 32], strides = [1, 1, 1]} : vector<2x16x128xbf16> to vector<2x16x32xbf16>
    %42 = vector.extract_strided_slice %33 {offsets = [0, 0, 0], sizes = [2, 16, 32], strides = [1, 1, 1]} : vector<2x16x128xbf16> to vector<2x16x32xbf16>
    "tpu.trace_start"() <{level = 10 : i32, message = "bqd,bkd->bqk"}> : () -> ()
    %cst_15 = arith.constant dense<0.000000e+00> : vector<2x16x16xf32>
    %43 = tpu.matmul %41, %42, %cst_15 {dimension_numbers = #tpu.dot_dimension_numbers<[2], [2], [1], [1], [0, 0, 0, 1, 1, 1], [0], [0]>} : vector<2x16x32xbf16>, vector<2x16x32xbf16>, vector<2x16x16xf32> -> vector<2x16x16xf32>
    "tpu.trace_stop"() : () -> ()
    %cst_16 = arith.constant 0.176776692 : f32
    %44 = vector.broadcast %cst_16 : f32 to vector<2x16x16xf32>
    %45 = arith.mulf %43, %44 : vector<2x16x16xf32>
    %46 = vector.shape_cast %40 : vector<16x16xf32> to vector<1x16x16xf32>
    %47 = vector.broadcast %46 : vector<1x16x16xf32> to vector<2x16x16xf32>
    %48 = arith.addf %45, %47 : vector<2x16x16xf32>
    %cst_17 = arith.constant dense<0xFF800000> : vector<2x16xf32>
    %49 = vector.multi_reduction <maximumf>, %48, %cst_17 [2] : vector<2x16x16xf32> to vector<2x16xf32>
    %50 = vector.shape_cast %49 : vector<2x16xf32> to vector<2x16x1xf32>
    %51 = vector.broadcast %50 : vector<2x16x1xf32> to vector<2x16x16xf32>
    %52 = arith.subf %48, %51 : vector<2x16x16xf32>
    %53 = math.exp %52 : vector<2x16x16xf32>
    %cst_18 = arith.constant dense<0.000000e+00> : vector<2x16xf32>
    %54 = vector.multi_reduction <add>, %53, %cst_18 [2] : vector<2x16x16xf32> to vector<2x16xf32>
    %55 = vector.shape_cast %54 : vector<2x16xf32> to vector<2x16x1xf32>
    %56 = tpu.reciprocal %55 {approx = true} : vector<2x16x1xf32> -> vector<2x16x1xf32>
    %57 = vector.broadcast %56 : vector<2x16x1xf32> to vector<2x16x16xf32>
    %58 = arith.mulf %53, %57 : vector<2x16x16xf32>
    %59 = arith.truncf %58 : vector<2x16x16xf32> to vector<2x16x16xbf16>
    %60 = vector.extract_strided_slice %34 {offsets = [0, 0, 0], sizes = [2, 16, 32], strides = [1, 1, 1]} : vector<2x16x128xbf16> to vector<2x16x32xbf16>
    "tpu.trace_start"() <{level = 10 : i32, message = "bqk,bkd->bqd"}> : () -> ()
    %cst_19 = arith.constant dense<0.000000e+00> : vector<2x16x32xf32>
    %61 = tpu.matmul %59, %60, %cst_19 {dimension_numbers = #tpu.dot_dimension_numbers<[2], [1], [1], [2], [0, 0, 0, 1, 1, 2], [0], [0]>} : vector<2x16x16xbf16>, vector<2x16x32xbf16>, vector<2x16x32xf32> -> vector<2x16x32xf32>
    "tpu.trace_stop"() : () -> ()
    %62 = vector.extract_strided_slice %32 {offsets = [0, 0, 32], sizes = [2, 16, 32], strides = [1, 1, 1]} : vector<2x16x128xbf16> to vector<2x16x32xbf16>
    %63 = vector.extract_strided_slice %33 {offsets = [0, 0, 32], sizes = [2, 16, 32], strides = [1, 1, 1]} : vector<2x16x128xbf16> to vector<2x16x32xbf16>
    "tpu.trace_start"() <{level = 10 : i32, message = "bqd,bkd->bqk"}> : () -> ()
    %cst_20 = arith.constant dense<0.000000e+00> : vector<2x16x16xf32>
    %64 = tpu.matmul %62, %63, %cst_20 {dimension_numbers = #tpu.dot_dimension_numbers<[2], [2], [1], [1], [0, 0, 0, 1, 1, 1], [0], [0]>} : vector<2x16x32xbf16>, vector<2x16x32xbf16>, vector<2x16x16xf32> -> vector<2x16x16xf32>
    "tpu.trace_stop"() : () -> ()
    %cst_21 = arith.constant 0.176776692 : f32
    %65 = vector.broadcast %cst_21 : f32 to vector<2x16x16xf32>
    %66 = arith.mulf %64, %65 : vector<2x16x16xf32>
    %67 = vector.shape_cast %40 : vector<16x16xf32> to vector<1x16x16xf32>
    %68 = vector.broadcast %67 : vector<1x16x16xf32> to vector<2x16x16xf32>
    %69 = arith.addf %66, %68 : vector<2x16x16xf32>
    %cst_22 = arith.constant dense<0xFF800000> : vector<2x16xf32>
    %70 = vector.multi_reduction <maximumf>, %69, %cst_22 [2] : vector<2x16x16xf32> to vector<2x16xf32>
    %71 = vector.shape_cast %70 : vector<2x16xf32> to vector<2x16x1xf32>
    %72 = vector.broadcast %71 : vector<2x16x1xf32> to vector<2x16x16xf32>
    %73 = arith.subf %69, %72 : vector<2x16x16xf32>
    %74 = math.exp %73 : vector<2x16x16xf32>
    %cst_23 = arith.constant dense<0.000000e+00> : vector<2x16xf32>
    %75 = vector.multi_reduction <add>, %74, %cst_23 [2] : vector<2x16x16xf32> to vector<2x16xf32>
    %76 = vector.shape_cast %75 : vector<2x16xf32> to vector<2x16x1xf32>
    %77 = tpu.reciprocal %76 {approx = true} : vector<2x16x1xf32> -> vector<2x16x1xf32>
    %78 = vector.broadcast %77 : vector<2x16x1xf32> to vector<2x16x16xf32>
    %79 = arith.mulf %74, %78 : vector<2x16x16xf32>
    %80 = arith.truncf %79 : vector<2x16x16xf32> to vector<2x16x16xbf16>
    %81 = vector.extract_strided_slice %34 {offsets = [0, 0, 32], sizes = [2, 16, 32], strides = [1, 1, 1]} : vector<2x16x128xbf16> to vector<2x16x32xbf16>
    "tpu.trace_start"() <{level = 10 : i32, message = "bqk,bkd->bqd"}> : () -> ()
    %cst_24 = arith.constant dense<0.000000e+00> : vector<2x16x32xf32>
    %82 = tpu.matmul %80, %81, %cst_24 {dimension_numbers = #tpu.dot_dimension_numbers<[2], [1], [1], [2], [0, 0, 0, 1, 1, 2], [0], [0]>} : vector<2x16x16xbf16>, vector<2x16x32xbf16>, vector<2x16x32xf32> -> vector<2x16x32xf32>
    "tpu.trace_stop"() : () -> ()
    %83 = vector.extract_strided_slice %32 {offsets = [0, 0, 64], sizes = [2, 16, 32], strides = [1, 1, 1]} : vector<2x16x128xbf16> to vector<2x16x32xbf16>
    %84 = vector.extract_strided_slice %33 {offsets = [0, 0, 64], sizes = [2, 16, 32], strides = [1, 1, 1]} : vector<2x16x128xbf16> to vector<2x16x32xbf16>
    "tpu.trace_start"() <{level = 10 : i32, message = "bqd,bkd->bqk"}> : () -> ()
    %cst_25 = arith.constant dense<0.000000e+00> : vector<2x16x16xf32>
    %85 = tpu.matmul %83, %84, %cst_25 {dimension_numbers = #tpu.dot_dimension_numbers<[2], [2], [1], [1], [0, 0, 0, 1, 1, 1], [0], [0]>} : vector<2x16x32xbf16>, vector<2x16x32xbf16>, vector<2x16x16xf32> -> vector<2x16x16xf32>
    "tpu.trace_stop"() : () -> ()
    %cst_26 = arith.constant 0.176776692 : f32
    %86 = vector.broadcast %cst_26 : f32 to vector<2x16x16xf32>
    %87 = arith.mulf %85, %86 : vector<2x16x16xf32>
    %88 = vector.shape_cast %40 : vector<16x16xf32> to vector<1x16x16xf32>
    %89 = vector.broadcast %88 : vector<1x16x16xf32> to vector<2x16x16xf32>
    %90 = arith.addf %87, %89 : vector<2x16x16xf32>
    %cst_27 = arith.constant dense<0xFF800000> : vector<2x16xf32>
    %91 = vector.multi_reduction <maximumf>, %90, %cst_27 [2] : vector<2x16x16xf32> to vector<2x16xf32>
    %92 = vector.shape_cast %91 : vector<2x16xf32> to vector<2x16x1xf32>
    %93 = vector.broadcast %92 : vector<2x16x1xf32> to vector<2x16x16xf32>
    %94 = arith.subf %90, %93 : vector<2x16x16xf32>
    %95 = math.exp %94 : vector<2x16x16xf32>
    %cst_28 = arith.constant dense<0.000000e+00> : vector<2x16xf32>
    %96 = vector.multi_reduction <add>, %95, %cst_28 [2] : vector<2x16x16xf32> to vector<2x16xf32>
    %97 = vector.shape_cast %96 : vector<2x16xf32> to vector<2x16x1xf32>
    %98 = tpu.reciprocal %97 {approx = true} : vector<2x16x1xf32> -> vector<2x16x1xf32>
    %99 = vector.broadcast %98 : vector<2x16x1xf32> to vector<2x16x16xf32>
    %100 = arith.mulf %95, %99 : vector<2x16x16xf32>
    %101 = arith.truncf %100 : vector<2x16x16xf32> to vector<2x16x16xbf16>
    %102 = vector.extract_strided_slice %34 {offsets = [0, 0, 64], sizes = [2, 16, 32], strides = [1, 1, 1]} : vector<2x16x128xbf16> to vector<2x16x32xbf16>
    "tpu.trace_start"() <{level = 10 : i32, message = "bqk,bkd->bqd"}> : () -> ()
    %cst_29 = arith.constant dense<0.000000e+00> : vector<2x16x32xf32>
    %103 = tpu.matmul %101, %102, %cst_29 {dimension_numbers = #tpu.dot_dimension_numbers<[2], [1], [1], [2], [0, 0, 0, 1, 1, 2], [0], [0]>} : vector<2x16x16xbf16>, vector<2x16x32xbf16>, vector<2x16x32xf32> -> vector<2x16x32xf32>
    "tpu.trace_stop"() : () -> ()
    %104 = vector.extract_strided_slice %32 {offsets = [0, 0, 96], sizes = [2, 16, 32], strides = [1, 1, 1]} : vector<2x16x128xbf16> to vector<2x16x32xbf16>
    %105 = vector.extract_strided_slice %33 {offsets = [0, 0, 96], sizes = [2, 16, 32], strides = [1, 1, 1]} : vector<2x16x128xbf16> to vector<2x16x32xbf16>
    "tpu.trace_start"() <{level = 10 : i32, message = "bqd,bkd->bqk"}> : () -> ()
    %cst_30 = arith.constant dense<0.000000e+00> : vector<2x16x16xf32>
    %106 = tpu.matmul %104, %105, %cst_30 {dimension_numbers = #tpu.dot_dimension_numbers<[2], [2], [1], [1], [0, 0, 0, 1, 1, 1], [0], [0]>} : vector<2x16x32xbf16>, vector<2x16x32xbf16>, vector<2x16x16xf32> -> vector<2x16x16xf32>
    "tpu.trace_stop"() : () -> ()
    %cst_31 = arith.constant 0.176776692 : f32
    %107 = vector.broadcast %cst_31 : f32 to vector<2x16x16xf32>
    %108 = arith.mulf %106, %107 : vector<2x16x16xf32>
    %109 = vector.shape_cast %40 : vector<16x16xf32> to vector<1x16x16xf32>
    %110 = vector.broadcast %109 : vector<1x16x16xf32> to vector<2x16x16xf32>
    %111 = arith.addf %108, %110 : vector<2x16x16xf32>
    %cst_32 = arith.constant dense<0xFF800000> : vector<2x16xf32>
    %112 = vector.multi_reduction <maximumf>, %111, %cst_32 [2] : vector<2x16x16xf32> to vector<2x16xf32>
    %113 = vector.shape_cast %112 : vector<2x16xf32> to vector<2x16x1xf32>
    %114 = vector.broadcast %113 : vector<2x16x1xf32> to vector<2x16x16xf32>
    %115 = arith.subf %111, %114 : vector<2x16x16xf32>
    %116 = math.exp %115 : vector<2x16x16xf32>
    %cst_33 = arith.constant dense<0.000000e+00> : vector<2x16xf32>
    %117 = vector.multi_reduction <add>, %116, %cst_33 [2] : vector<2x16x16xf32> to vector<2x16xf32>
    %118 = vector.shape_cast %117 : vector<2x16xf32> to vector<2x16x1xf32>
    %119 = tpu.reciprocal %118 {approx = true} : vector<2x16x1xf32> -> vector<2x16x1xf32>
    %120 = vector.broadcast %119 : vector<2x16x1xf32> to vector<2x16x16xf32>
    %121 = arith.mulf %116, %120 : vector<2x16x16xf32>
    %122 = arith.truncf %121 : vector<2x16x16xf32> to vector<2x16x16xbf16>
    %123 = vector.extract_strided_slice %34 {offsets = [0, 0, 96], sizes = [2, 16, 32], strides = [1, 1, 1]} : vector<2x16x128xbf16> to vector<2x16x32xbf16>
    "tpu.trace_start"() <{level = 10 : i32, message = "bqk,bkd->bqd"}> : () -> ()
    %cst_34 = arith.constant dense<0.000000e+00> : vector<2x16x32xf32>
    %124 = tpu.matmul %122, %123, %cst_34 {dimension_numbers = #tpu.dot_dimension_numbers<[2], [1], [1], [2], [0, 0, 0, 1, 1, 2], [0], [0]>} : vector<2x16x16xbf16>, vector<2x16x32xbf16>, vector<2x16x32xf32> -> vector<2x16x32xf32>
    "tpu.trace_stop"() : () -> ()
    %125 = tpu.concatenate %61, %82, %103, %124 in 2 : vector<2x16x32xf32>, vector<2x16x32xf32>, vector<2x16x32xf32>, vector<2x16x32xf32> -> vector<2x16x128xf32>
    %126 = vector.shape_cast %125 : vector<2x16x128xf32> to vector<32x128xf32>
    %127 = arith.truncf %126 : vector<32x128xf32> to vector<32x128xbf16>
    %c0_35 = arith.constant 0 : index
    %c0_36 = arith.constant 0 : index
    %128 = vector.load %arg4[%c0_35, %c0_36] : memref<128x128xbf16, #tpu.memory_space<vmem>>, vector<128x128xbf16>
    %cst_37 = arith.constant dense<0.000000e+00> : vector<32x128xf32>
    %129 = tpu.matmul %127, %128, %cst_37 {dimension_numbers = #tpu.dot_dimension_numbers<[1], [0], [0], [1], [0, 0, 1, 1], [], []>} : vector<32x128xbf16>, vector<128x128xbf16>, vector<32x128xf32> -> vector<32x128xf32>
    %130 = arith.addf %2, %129 : vector<32x128xf32>
    %c0_38 = arith.constant 0 : index
    %c0_39 = arith.constant 0 : index
    %131 = vector.load %arg5[%c0_38, %c0_39] : memref<1x128xf32, #tpu.memory_space<vmem>>, vector<1x128xf32>
    %c0_40 = arith.constant 0 : index
    %c0_41 = arith.constant 0 : index
    %132 = vector.load %arg6[%c0_40, %c0_41] : memref<1x128xf32, #tpu.memory_space<vmem>>, vector<1x128xf32>
    %cst_42 = arith.constant dense<0.000000e+00> : vector<32xf32>
    %133 = vector.multi_reduction <add>, %130, %cst_42 [1] : vector<32x128xf32> to vector<32xf32>
    %134 = vector.shape_cast %133 : vector<32xf32> to vector<32x1xf32>
    %cst_43 = arith.constant 1.280000e+02 : f32
    %135 = vector.broadcast %cst_43 : f32 to vector<32x1xf32>
    %136 = arith.divf %134, %135 : vector<32x1xf32>
    %137 = vector.broadcast %136 : vector<32x1xf32> to vector<32x128xf32>
    %138 = arith.subf %130, %137 : vector<32x128xf32>
    %139 = arith.mulf %138, %138 : vector<32x128xf32>
    %cst_44 = arith.constant dense<0.000000e+00> : vector<32xf32>
    %140 = vector.multi_reduction <add>, %139, %cst_44 [1] : vector<32x128xf32> to vector<32xf32>
    %141 = vector.shape_cast %140 : vector<32xf32> to vector<32x1xf32>
    %cst_45 = arith.constant 1.280000e+02 : f32
    %142 = vector.broadcast %cst_45 : f32 to vector<32x1xf32>
    %143 = arith.divf %141, %142 : vector<32x1xf32>
    %144 = vector.broadcast %136 : vector<32x1xf32> to vector<32x128xf32>
    %145 = arith.subf %130, %144 : vector<32x128xf32>
    %cst_46 = arith.constant 9.99999974E-6 : f32
    %146 = vector.broadcast %cst_46 : f32 to vector<32x1xf32>
    %147 = arith.addf %143, %146 : vector<32x1xf32>
    %148 = math.rsqrt %147 : vector<32x1xf32>
    %149 = vector.broadcast %148 : vector<32x1xf32> to vector<32x128xf32>
    %150 = arith.mulf %145, %149 : vector<32x128xf32>
    %151 = vector.broadcast %131 : vector<1x128xf32> to vector<32x128xf32>
    %152 = arith.mulf %150, %151 : vector<32x128xf32>
    %153 = vector.broadcast %132 : vector<1x128xf32> to vector<32x128xf32>
    %154 = arith.addf %152, %153 : vector<32x128xf32>
    %155 = arith.truncf %154 : vector<32x128xf32> to vector<32x128xbf16>
    %c0_47 = arith.constant 0 : index
    %c0_48 = arith.constant 0 : index
    %156 = vector.load %arg7[%c0_47, %c0_48] : memref<128x512xbf16, #tpu.memory_space<vmem>>, vector<128x512xbf16>
    %cst_49 = arith.constant dense<0.000000e+00> : vector<32x512xf32>
    %157 = tpu.matmul %155, %156, %cst_49 {dimension_numbers = #tpu.dot_dimension_numbers<[1], [0], [0], [1], [0, 0, 1, 1], [], []>} : vector<32x128xbf16>, vector<128x512xbf16>, vector<32x512xf32> -> vector<32x512xf32>
    %c0_50 = arith.constant 0 : index
    %c0_51 = arith.constant 0 : index
    %158 = vector.load %arg8[%c0_50, %c0_51] : memref<1x512xf32, #tpu.memory_space<vmem>>, vector<1x512xf32>
    %159 = vector.broadcast %158 : vector<1x512xf32> to vector<32x512xf32>
    %160 = arith.addf %157, %159 : vector<32x512xf32>
    %161 = arith.mulf %160, %160 : vector<32x512xf32>
    %162 = arith.mulf %160, %161 : vector<32x512xf32>
    %cst_52 = arith.constant 4.471500e-02 : f32
    %163 = vector.broadcast %cst_52 : f32 to vector<32x512xf32>
    %164 = arith.mulf %163, %162 : vector<32x512xf32>
    %165 = arith.addf %160, %164 : vector<32x512xf32>
    %cst_53 = arith.constant 0.797884583 : f32
    %166 = vector.broadcast %cst_53 : f32 to vector<32x512xf32>
    %167 = arith.mulf %166, %165 : vector<32x512xf32>
    %168 = math.tanh %167 : vector<32x512xf32>
    %cst_54 = arith.constant 1.000000e+00 : f32
    %169 = vector.broadcast %cst_54 : f32 to vector<32x512xf32>
    %170 = arith.addf %169, %168 : vector<32x512xf32>
    %cst_55 = arith.constant 5.000000e-01 : f32
    %171 = vector.broadcast %cst_55 : f32 to vector<32x512xf32>
    %172 = arith.mulf %171, %170 : vector<32x512xf32>
    %173 = arith.mulf %160, %172 : vector<32x512xf32>
    %174 = arith.truncf %173 : vector<32x512xf32> to vector<32x512xbf16>
    %c0_56 = arith.constant 0 : index
    %c0_57 = arith.constant 0 : index
    %175 = vector.load %arg9[%c0_56, %c0_57] : memref<512x128xbf16, #tpu.memory_space<vmem>>, vector<512x128xbf16>
    %cst_58 = arith.constant dense<0.000000e+00> : vector<32x128xf32>
    %176 = tpu.matmul %174, %175, %cst_58 {dimension_numbers = #tpu.dot_dimension_numbers<[1], [0], [0], [1], [0, 0, 1, 1], [], []>} : vector<32x512xbf16>, vector<512x128xbf16>, vector<32x128xf32> -> vector<32x128xf32>
    %c0_59 = arith.constant 0 : index
    %c0_60 = arith.constant 0 : index
    %177 = vector.load %arg10[%c0_59, %c0_60] : memref<1x128xf32, #tpu.memory_space<vmem>>, vector<1x128xf32>
    %178 = vector.broadcast %177 : vector<1x128xf32> to vector<32x128xf32>
    %179 = arith.addf %176, %178 : vector<32x128xf32>
    %180 = arith.addf %130, %179 : vector<32x128xf32>
    %c0_61 = arith.constant 0 : index
    %c0_62 = arith.constant 0 : index
    %181 = vector.load %arg11[%c0_61, %c0_62] : memref<1x128xf32, #tpu.memory_space<vmem>>, vector<1x128xf32>
    %c0_63 = arith.constant 0 : index
    %c0_64 = arith.constant 0 : index
    %182 = vector.load %arg12[%c0_63, %c0_64] : memref<1x128xf32, #tpu.memory_space<vmem>>, vector<1x128xf32>
    %cst_65 = arith.constant dense<0.000000e+00> : vector<32xf32>
    %183 = vector.multi_reduction <add>, %180, %cst_65 [1] : vector<32x128xf32> to vector<32xf32>
    %184 = vector.shape_cast %183 : vector<32xf32> to vector<32x1xf32>
    %cst_66 = arith.constant 1.280000e+02 : f32
    %185 = vector.broadcast %cst_66 : f32 to vector<32x1xf32>
    %186 = arith.divf %184, %185 : vector<32x1xf32>
    %187 = vector.broadcast %186 : vector<32x1xf32> to vector<32x128xf32>
    %188 = arith.subf %180, %187 : vector<32x128xf32>
    %189 = arith.mulf %188, %188 : vector<32x128xf32>
    %cst_67 = arith.constant dense<0.000000e+00> : vector<32xf32>
    %190 = vector.multi_reduction <add>, %189, %cst_67 [1] : vector<32x128xf32> to vector<32xf32>
    %191 = vector.shape_cast %190 : vector<32xf32> to vector<32x1xf32>
    %cst_68 = arith.constant 1.280000e+02 : f32
    %192 = vector.broadcast %cst_68 : f32 to vector<32x1xf32>
    %193 = arith.divf %191, %192 : vector<32x1xf32>
    %194 = vector.broadcast %186 : vector<32x1xf32> to vector<32x128xf32>
    %195 = arith.subf %180, %194 : vector<32x128xf32>
    %cst_69 = arith.constant 9.99999974E-6 : f32
    %196 = vector.broadcast %cst_69 : f32 to vector<32x1xf32>
    %197 = arith.addf %193, %196 : vector<32x1xf32>
    %198 = math.rsqrt %197 : vector<32x1xf32>
    %199 = vector.broadcast %198 : vector<32x1xf32> to vector<32x128xf32>
    %200 = arith.mulf %195, %199 : vector<32x128xf32>
    %201 = vector.broadcast %181 : vector<1x128xf32> to vector<32x128xf32>
    %202 = arith.mulf %200, %201 : vector<32x128xf32>
    %203 = vector.broadcast %182 : vector<1x128xf32> to vector<32x128xf32>
    %204 = arith.addf %202, %203 : vector<32x128xf32>
    %205 = arith.truncf %204 : vector<32x128xf32> to vector<32x128xbf16>
    %c0_70 = arith.constant 0 : index
    %c0_71 = arith.constant 0 : index
    %206 = vector.load %arg13[%c0_70, %c0_71] : memref<128x512xbf16, #tpu.memory_space<vmem>>, vector<128x512xbf16>
    %cst_72 = arith.constant dense<0.000000e+00> : vector<32x512xf32>
    %207 = tpu.matmul %205, %206, %cst_72 {dimension_numbers = #tpu.dot_dimension_numbers<[1], [0], [0], [1], [0, 0, 1, 1], [], []>} : vector<32x128xbf16>, vector<128x512xbf16>, vector<32x512xf32> -> vector<32x512xf32>
    %c0_73 = arith.constant 0 : index
    %c0_74 = arith.constant 0 : index
    %208 = vector.load %arg14[%c0_73, %c0_74] : memref<1x512xf32, #tpu.memory_space<vmem>>, vector<1x512xf32>
    %209 = vector.broadcast %208 : vector<1x512xf32> to vector<32x512xf32>
    %210 = arith.addf %207, %209 : vector<32x512xf32>
    %211 = vector.shape_cast %210 : vector<32x512xf32> to vector<2x16x512xf32>
    %c0_75 = arith.constant 0 : index
    %c0_76 = arith.constant 0 : index
    %c0_77 = arith.constant 0 : index
    %212 = vector.load %arg15[%c0_75, %c0_76, %c0_77] : memref<2x16x512xf32, #tpu.memory_space<vmem>>, vector<2x16x512xf32>
    tpu.vector_store %arg15[%c0_75, %c0_76, %c0_77], %211 {strides = array<i32>} : memref<2x16x512xf32, #tpu.memory_space<vmem>>, vector<2x16x512xf32>,
    return
  }
}

</mosaic_0001>

<bundles_post_ra>
// kernel: llava_forward.2
= control target key start
LH: loop header
LB: loop body
LE: loop exit
PB: predicated region body
PF: predicated region fallthrough
CT: control target
= control target key end

     0   :  { %v642_v26 = vmov 0.0   ;;  %vm643_vm0 = vmmov 0   ;;  %s829_s1 = inlined_call_operand.vmem [shape: bf16[256,128], index: 1, kind: input, shape index: {}]   ;;  %s830_s0 = inlined_call_operand.vmem [shape: bf16[8,256], index: 0, kind: input, shape index: {}]   ;;  %s831_s2 = inlined_call_operand.vmem [shape: f32[1,128], index: 2, kind: input, shape index: {}]   ;;  %s832_s5 = inlined_call_operand.vmem [shape: bf16[128,128], index: 5, kind: input, shape index: {}]   ;;  %s833_s3 = inlined_call_operand.vmem [shape: f32[1,128], index: 3, kind: input, shape index: {}]   ;;  %s834_s4 = inlined_call_operand.vmem [shape: f32[1,128], index: 4, kind: input, shape index: {}]   ;;  %s835_s7 = inlined_call_operand.vmem [shape: bf16[128,128], index: 7, kind: input, shape index: {}]   ;;  %s836_s6 = inlined_call_operand.vmem [shape: f32[1,128], index: 6, kind: input, shape index: {}]   ;;  %s837_s8 = inlined_call_operand.vmem [shape: f32[1,128], index: 8, kind: input, shape index: {}]   ;;  %s838_s9 = inlined_call_operand.vmem [shape: bf16[8,128], index: 9, kind: output, shape index: {}]  }
   0x1   :  { %v604_v0 = vld [vmem:[%s829_s1 + $0x40] sm:$0xff]   ;;  %v606_v2 = vld [vmem:[%s829_s1 + $0x48] sm:$0xff]   ;;  %v608_v4 = vld [vmem:[%s829_s1 + $0x50] sm:$0xff]   ;;  %562 = vmatprep.subr.bf16.mxu1 %v642_v26  ;;  %578 = vmatprep.mubr.msk.bf16.mxu1 %vm643_vm0, %v642_v26 }
   0x2   :  { %v605_v1 = vld [vmem:[%s829_s1] sm:$0xff]   ;;  %522 = vmatprep.subr.bf16.mxu0 %v604_v0  ;;  %v607_v3 = vld [vmem:[%s829_s1 + $0x8] sm:$0xff]   ;;  %v609_v5 = vld [vmem:[%s829_s1 + $0x10] sm:$0xff]  }
   0x3   :  { %523 = vmatpush3.bf16.msra.mxu0 %v605_v1  ;;  %v610_v6 = vld [vmem:[%s829_s1 + $0x58] sm:$0xff]   ;;  %v612_v8 = vld [vmem:[%s829_s1 + $0x60] sm:$0xff]   ;;  %v614_v10 = vld [vmem:[%s829_s1 + $0x68] sm:$0xff]  }
   0x4   :  { %524 = vmatprep.subr.bf16.mxu0 %v606_v2  ;;  %v611_v7 = vld [vmem:[%s829_s1 + $0x18] sm:$0xff]   ;;  %v613_v9 = vld [vmem:[%s829_s1 + $0x20] sm:$0xff]   ;;  %v615_v13 = vld [vmem:[%s829_s1 + $0x28] sm:$0xff]  }
   0x5   :  { %v33_v11 = vld [vmem:[%s830_s0] sm:$0xff]  ;;  %v616_v14 = vld [vmem:[%s829_s1 + $0x70] sm:$0xff]   ;;  %v618_v16 = vld [vmem:[%s829_s1 + $0x78] sm:$0xff]  }
   0x6   :  { %v485_v12 = vcombine.high %v33_v11, %v33_v11  ;;  %v617_v15 = vld [vmem:[%s829_s1 + $0x30] sm:$0xff]   ;;  %v619_v17 = vld [vmem:[%s829_s1 + $0x38] sm:$0xff]   ;;  %v484_v18 = vcombine.low %v33_v11, %v33_v11  ;;  %v483_v21 = vld [vmem:[%s831_s2] ss:$0 sm:$0xff] }
   0x7   :  { %525 = vmatpush3.bf16.msra.mxu0 %v607_v3  ;;  %v622_v27 = vld [vmem:[%s832_s5] sm:$0xff]   ;;  %v623_v28 = vld [vmem:[%s832_s5 + $0x8] sm:$0xff]   ;;  %v624_v33 = vld [vmem:[%s832_s5 + $0x10] sm:$0xff]  }
   0x8   :  { %526 = vmatprep.subr.bf16.mxu0 %v608_v4  ;;  %208 = vmatprep.mubr.bf16.mxu0 %v485_v12  ;;  %v625_v34 = vld [vmem:[%s832_s5 + $0x18] sm:$0xff]   ;;  %v626_v35 = vld [vmem:[%s832_s5 + $0x20] sm:$0xff]   ;;  %v627_v36 = vld [vmem:[%s832_s5 + $0x28] sm:$0xff]  }
   0x9   :  { %563 = vmatpush3.bf16.msra.mxu1 %v622_v27  ;;  %v628_v37 = vld [vmem:[%s832_s5 + $0x30] sm:$0xff]   ;;  %v629_v38 = vld [vmem:[%s832_s5 + $0x38] sm:$0xff]   ;;  %v502_v43 = vld [vmem:[%s833_s3] ss:$0 sm:$0xff] }
   0xa   :  { %564 = vmatprep.subr.bf16.mxu1 %v642_v26  ;;  %v503_v45 = vld [vmem:[%s834_s4] ss:$0 sm:$0xff]  ;;  %v631_v50 = vld [vmem:[%s835_s7 + $0x8] sm:$0xff]   ;;  %v632_v51 = vld [vmem:[%s835_s7 + $0x10] sm:$0xff]  }
   0xb   :  { %527 = vmatpush3.bf16.msra.mxu0 %v609_v5  ;;  %v630_v49 = vld [vmem:[%s835_s7] sm:$0xff]   ;;  %v633_v52 = vld [vmem:[%s835_s7 + $0x18] sm:$0xff]   ;;  %v635_v54 = vld [vmem:[%s835_s7 + $0x28] sm:$0xff]  }
   0xc   :  { %528 = vmatprep.subr.bf16.mxu0 %v610_v6  ;;  %v634_v53 = vld [vmem:[%s835_s7 + $0x20] sm:$0xff]   ;;  %v636_v55 = vld [vmem:[%s835_s7 + $0x30] sm:$0xff]   ;;  %v637_v56 = vld [vmem:[%s835_s7 + $0x38] sm:$0xff]  }
   0xd   :  { %565 = vmatpush3.bf16.msra.mxu1 %v623_v28  ;;  %v504_v57 = vld [vmem:[%s836_s6] ss:$0 sm:$0xff] }
   0xe   :  { %566 = vmatprep.subr.bf16.mxu1 %v642_v26 }
   0xf   :  { %529 = vmatpush3.bf16.msra.mxu0 %v611_v7 }
  0x10   :  { %530 = vmatprep.subr.bf16.mxu0 %v612_v8 }
  0x11   :  { %567 = vmatpush3.bf16.msra.mxu1 %v624_v33 }
  0x12   :  { %568 = vmatprep.subr.bf16.mxu1 %v642_v26 }
  0x13   :  { %531 = vmatpush3.bf16.msra.mxu0 %v613_v9  ;;  %v513_v9 = vld [vmem:[%s837_s8] ss:$0 sm:$0xff] }
  0x14   :  { %532 = vmatprep.subr.bf16.mxu0 %v614_v10 }
  0x15   :  { %569 = vmatpush3.bf16.msra.mxu1 %v625_v34 }
  0x16   :  { %570 = vmatprep.subr.bf16.mxu1 %v642_v26 }
  0x17   :  { %533 = vmatpush3.bf16.msra.mxu0 %v615_v13 }
  0x18   :  { %534 = vmatprep.subr.bf16.mxu0 %v616_v14 }
  0x19   :  { %571 = vmatpush3.bf16.msra.mxu1 %v626_v35 }
  0x1a   :  { %572 = vmatprep.subr.bf16.mxu1 %v642_v26 }
  0x1b   :  { %535 = vmatpush3.bf16.msra.mxu0 %v617_v15 }
  0x1c   :  { %536 = vmatprep.subr.bf16.mxu0 %v618_v16 }
  0x1d   :  { %573 = vmatpush3.bf16.msra.mxu1 %v627_v36 }
  0x1e   :  { %574 = vmatprep.subr.bf16.mxu1 %v642_v26 }
  0x1f   :  { %537 = vmatpush3.bf16.msra.mxu0 %v619_v17 }
  0x20   :  { %582 = vmatprep.subr.bf16.mxu0 %v642_v26 }
  0x21   :  { %575 = vmatpush3.bf16.msra.mxu1 %v628_v37 }
  0x22   :  { %209 = vmatmul.mubr.bf16.vlgmr.msra.gmra.mrb[0].mxu0 %v484_v18  ;;  %576 = vmatprep.subr.bf16.mxu1 %v642_v26 }
  0x23   :  { %598 = vmatprep.mubr.msk.bf16.mxu0 %vm643_vm0, %v642_v26  ;;  %583 = vmatpush3.bf16.msra.mxu0 %v630_v49 }
  0x24   :  { %584 = vmatprep.subr.bf16.mxu0 %v642_v26 }
  0x25   :  { %577 = vmatpush3.bf16.msra.mxu1 %v629_v38 }
  0x27   :  { %585 = vmatpush3.bf16.msra.mxu0 %v631_v50 }
  0x28   :  { %586 = vmatprep.subr.bf16.mxu0 %v642_v26 }
  0x2b   :  { %587 = vmatpush3.bf16.msra.mxu0 %v632_v51 }
  0x2c   :  { %588 = vmatprep.subr.bf16.mxu0 %v642_v26 }
  0x2f   :  { %589 = vmatpush3.bf16.msra.mxu0 %v633_v52 }
  0x30   :  { %590 = vmatprep.subr.bf16.mxu0 %v642_v26 }
  0x33   :  { %591 = vmatpush3.bf16.msra.mxu0 %v634_v53 }
  0x34   :  { %592 = vmatprep.subr.bf16.mxu0 %v642_v26 }
  0x37   :  { %593 = vmatpush3.bf16.msra.mxu0 %v635_v54 }
  0x38   :  { %594 = vmatprep.subr.bf16.mxu0 %v642_v26 }
  0x3b   :  { %595 = vmatpush3.bf16.msra.mxu0 %v636_v55 }
  0x3c   :  { %596 = vmatprep.subr.bf16.mxu0 %v642_v26 }
  0x3f   :  { %597 = vmatpush3.bf16.msra.mxu0 %v637_v56 }
  0xf5   :  { %v538_v19 = vpop.f32.mrb[0].mxu0 }
  0xf6   :  { %v539_v20 = vpop.f32.mrb[1].mxu0 }
  0xf7   :  { %v540_v22 = vadd.f32 %v539_v20, %v538_v19  ;;  %v541_v23 = vpop.f32.mrb[2].mxu0 }
  0xf8   :  { %v542_v24 = vpop.f32.mrb[3].mxu0 }
  0xf9   :  { %v211_v25 = vadd.f32 %v540_v22, %v483_v21 }
  0xfb   :  { %218 = vadd.xlane.f32.xlu0 %v211_v25 }
 0x188   :  { %v219_v29 = vpop.xlane.xlu0 %218 }
 0x189   :  { %v221_v30 = vmul.f32 0.0078125, %v219_v29 }
 0x18b   :  { %v222_v31 = vsub.f32 %v211_v25, %v221_v30 }
 0x18d   :  { %v223_v32 = vmul.f32 %v222_v31, %v222_v31 }
 0x18f   :  { %224 = vadd.xlane.f32.xlu0 %v223_v32 }
 0x21c   :  { %v225_v39 = vpop.xlane.xlu0 %224 }
 0x21d   :  { %v226_v40 = vmul.f32 0.0078125, %v225_v39 }
 0x21f   :  { %v227_v41 = vadd.f32 1e-05, %v226_v40 }
 0x221   :  { %638 = vrsqrt.f32 %v227_v41 }
 0x22b   :  { %v639_v42 = vpop.eup %638 }
 0x22c   :  { %v229_v44 = vmul.f32 %v639_v42, %v222_v31 }
 0x22e   :  { %v236_v46 = vmul.f32 %v502_v43, %v229_v44 }
 0x230   :  { %v243_v47 = vadd.f32 %v503_v45, %v236_v46 }
 0x232   :  { %v244_v48 = vpack.c.bf16 %v243_v47, %v243_v47 }
 0x234   :  { %579 = vmatmul.mubr.bf16.vlgmr.msra.gmra.mrb[0].mxu1 %v244_v48 }
 0x307   :  { %v350_v58 = vpop.f32.mrb[0].mxu1 }
 0x308   :  { %v351_v59 = vadd.f32 %v504_v57, %v350_v58  ;;  %v580_v60 = vpop.f32.mrb[1].mxu1 }
 0x309   :  { %v353_v61 = vpop.f32.mrb[2].mxu1 }
 0x30a   :  { %v356_v62 = vmul.f32 %v351_v59, %v351_v59  ;;  %v581_v63 = vpop.f32.mrb[3].mxu1 }
 0x30c   :  { %v357_v0 = vmul.f32 %v356_v62, %v351_v59 }
 0x30e   :  { %v358_v1 = vmul.f32 0.044715, %v357_v0 }
 0x310   :  { %v359_v2 = vadd.f32 %v358_v1, %v351_v59 }
 0x312   :  { %v360_v3 = vmul.f32 0.7978846, %v359_v2 }
 0x314   :  { %640 = vtanh.f32 %v360_v3 }
 0x31e   :  { %v641_v4 = vpop.eup %640 }
 0x31f   :  { %v362_v5 = vadd.f32 1.0, %v641_v4 }
 0x321   :  { %v363_v6 = vmul.f32 0.5, %v362_v5 }
 0x323   :  { %v364_v7 = vmul.f32 %v363_v6, %v351_v59 }
 0x325   :  { %v365_v8 = vpack.c.bf16 %v364_v7, %v364_v7 }
 0x327   :  { %599 = vmatmul.mubr.bf16.vlgmr.msra.gmra.mrb[4].mxu0 %v365_v8 }
 0x3fa   :  { %v471_v10 = vpop.f32.mrb[4].mxu0 }
 0x3fb   :  { %v472_v11 = vadd.f32 %v513_v9, %v471_v10  ;;  %v600_v12 = vpop.f32.mrb[5].mxu0 }
 0x3fc   :  { %v474_v13 = vpop.f32.mrb[6].mxu0 }
 0x3fd   :  { %v477_v14 = vpack.c.bf16 %v472_v11, %v472_v11  ;;  %v601_v15 = vpop.f32.mrb[7].mxu0 }
 0x3ff   :  { %478 = vst [vmem:[%s838_s9] sm:$0xf] %v477_v14 }

// kernel: llava_forward.3
= control target key start
LH: loop header
LB: loop body
LE: loop exit
PB: predicated region body
PF: predicated region fallthrough
CT: control target
= control target key end

     0   :  { %v3622_v41 = vmov 0   ;;  %vm3624_vm0 = vmmov 0   ;;  %vm405_vm1 = vcmask 261120   ;;  %vm508_vm4 = vcmask 130048   ;;  %s3628_s24 = smov 32   ;;  %s4676_s0 = inlined_call_operand.vmem [shape: bf16[2,16,128], index: 0, kind: input, shape index: {}]   ;;  %s4677_s3 = inlined_call_operand.vmem [shape: bf16[128,384], index: 3, kind: input, shape index: {}]   ;;  %s4678_s1 = inlined_call_operand.vmem [shape: f32[1,128], index: 1, kind: input, shape index: {}]   ;;  %s4679_s2 = inlined_call_operand.vmem [shape: f32[1,128], index: 2, kind: input, shape index: {}]   ;;  %s4680_s4 = inlined_call_operand.vmem [shape: bf16[128,128], index: 4, kind: input, shape index: {}]   ;;  %s4681_s7 = inlined_call_operand.vmem [shape: bf16[128,512], index: 7, kind: input, shape index: {}]   ;;  %s4682_s5 = inlined_call_operand.vmem [shape: f32[1,128], index: 5, kind: input, shape index: {}]   ;;  %s4683_s6 = inlined_call_operand.vmem [shape: f32[1,128], index: 6, kind: input, shape index: {}]   ;;  %s4684_s9 = inlined_call_operand.vmem [shape: bf16[512,128], index: 9, kind: input, shape index: {}]   ;;  %s4685_s8 = inlined_call_operand.vmem [shape: f32[1,512], index: 8, kind: input, shape index: {}]   ;;  %s4686_s10 = inlined_call_operand.vmem [shape: f32[1,128], index: 10, kind: input, shape index: {}]   ;;  %s4687_s13 = inlined_call_operand.vmem [shape: bf16[128,512], index: 13, kind: input, shape index: {}]   ;;  %s4688_s11 = inlined_call_operand.vmem [shape: f32[1,128], index: 11, kind: input, shape index: {}]   ;;  %s4689_s12 = inlined_call_operand.vmem [shape: f32[1,128], index: 12, kind: input, shape index: {}]   ;;  %s4690_s14 = inlined_call_operand.vmem [shape: f32[1,512], index: 14, kind: input, shape index: {}]   ;;  %s4691_s15 = inlined_call_operand.vmem [shape: f32[2,16,512], index: 15, kind: output, shape index: {}]  }
   0x1   :  { %v3045_v0 = vld [vmem:[%s4676_s0] sm:$0xff]   ;;  %v3052_v1 = vld [vmem:[%s4676_s0 + $0x8] sm:$0xff]   ;;  %v3344_v29 = vld [vmem:[%s4677_s3 + $0x30] ss:$12 sps:$4 sm:$0xff]   ;;  %320 = vmatprep.mubr.bf16.mxu0 %v3622_v41  ;;  %vm1451_vm5 = vcmask 523264   ;;  %vm1456_vm6 = vcmask 785408  }
   0x2   :  { %v3715_v2 = vunpack.c.l.bf16 %v3045_v0  ;;  %v3717_v3 = vunpack.c.l.bf16 %v3052_v1  ;;  %v3721_v4 = vunpack.c.h.bf16 %v3045_v0  ;;  %v3723_v5 = vunpack.c.h.bf16 %v3052_v1  ;;  %v3334_v6 = vld [vmem:[%s4677_s3 + $0x4] ss:$12 sps:$4 sm:$0xff]   ;;  %v3336_v7 = vld [vmem:[%s4677_s3] ss:$12 sps:$4 sm:$0xff]   ;;  %v3337_v8 = vld [vmem:[%s4677_s3 + $0x1c] ss:$12 sps:$4 sm:$0xff]  }
   0x3   :  { %288 = vmatprep.subr.bf16.mxu0 %v3334_v6  ;;  %v3339_v9 = vld [vmem:[%s4677_s3 + $0x8] ss:$12 sps:$4 sm:$0xff]   ;;  %v3340_v26 = vld [vmem:[%s4677_s3 + $0x18] ss:$12 sps:$4 sm:$0xff]   ;;  %v3343_v28 = vld [vmem:[%s4677_s3 + $0x20] ss:$12 sps:$4 sm:$0xff]  }
   0x4   :  { %61 = vadd.xlane.f32.xlu0 %v3715_v2  ;;  %65 = vadd.xlane.f32.xlu1 %v3717_v3  ;;  %v3341_v27 = vld [vmem:[%s4677_s3 + $0x34] ss:$12 sps:$4 sm:$0xff]   ;;  %v3345_v30 = vld [vmem:[%s4677_s3 + $0x4c] ss:$12 sps:$4 sm:$0xff]   ;;  %v3349_v33 = vld [vmem:[%s4677_s3 + $0x64] ss:$12 sps:$4 sm:$0xff]  }
   0x5   :  { %289 = vmatpush1.bf16.msra.mxu0 %v3336_v7  ;;  %3161 = vmatprep.subr.bf16.mxu1 %v3339_v9  ;;  %v3347_v31 = vld [vmem:[%s4677_s3 + $0x38] ss:$12 sps:$4 sm:$0xff]   ;;  %v3348_v32 = vld [vmem:[%s4677_s3 + $0x48] ss:$12 sps:$4 sm:$0xff]   ;;  %v3351_v34 = vld [vmem:[%s4677_s3 + $0x50] ss:$12 sps:$4 sm:$0xff]  }
   0x6   :  { %290 = vmatprep.subr.bf16.mxu0 %v3337_v8  ;;  %3162 = vmatpush3.bf16.msra.mxu1 %v3339_v9  ;;  %v3352_v35 = vld [vmem:[%s4677_s3 + $0x60] ss:$12 sps:$4 sm:$0xff]   ;;  %v3353_v36 = vld [vmem:[%s4677_s3 + $0x7c] ss:$12 sps:$4 sm:$0xff]   ;;  %v3356_v38 = vld [vmem:[%s4677_s3 + $0x78] ss:$12 sps:$4 sm:$0xff]  }
   0x7   :  { %3163 = vmatprep.subr.bf16.mxu1 %v3343_v28  ;;  %v3355_v37 = vld [vmem:[%s4677_s3 + $0x68] ss:$12 sps:$4 sm:$0xff]   ;;  %v3359_v40 = vld [vmem:[%s4677_s3 + $0x80] ss:$12 sps:$4 sm:$0xff]   ;;  %v3360_v42 = vld [vmem:[%s4677_s3 + $0x90] ss:$12 sps:$4 sm:$0xff]  }
   0x8   :  { %63 = vadd.xlane.f32.xlu0 %v3721_v4  ;;  %67 = vadd.xlane.f32.xlu1 %v3723_v5  ;;  %v3357_v39 = vld [vmem:[%s4677_s3 + $0x94] ss:$12 sps:$4 sm:$0xff]   ;;  %v3361_v43 = vld [vmem:[%s4677_s3 + $0xac] ss:$12 sps:$4 sm:$0xff]   ;;  %v3365_v46 = vld [vmem:[%s4677_s3 + $0xb0] ss:$12 sps:$4 sm:$0xff]  }
   0x9   :  { %291 = vmatpush1.bf16.msra.mxu0 %v3340_v26  ;;  %v3363_v44 = vld [vmem:[%s4677_s3 + $0x98] ss:$12 sps:$4 sm:$0xff]   ;;  %v3364_v45 = vld [vmem:[%s4677_s3 + $0xa8] ss:$12 sps:$4 sm:$0xff]   ;;  %v2893_v61 = vld [vmem:[%s4678_s1] ss:$0 sm:$0xff] }
   0xa   :  { %292 = vmatprep.subr.bf16.mxu0 %v3341_v27  ;;  %3164 = vmatpush3.bf16.msra.mxu1 %v3343_v28  ;;  %v2894_v6 = vld [vmem:[%s4679_s2] ss:$0 sm:$0xff]  ;;  %s3626_s1 = smov 96   ;;  %s3627_s2 = smov 64  }
   0xb   :  { %3165 = vmatprep.subr.bf16.mxu1 %v3347_v31 }
   0xd   :  { %293 = vmatpush1.bf16.msra.mxu0 %v3344_v29 }
   0xe   :  { %294 = vmatprep.subr.bf16.mxu0 %v3345_v30  ;;  %3166 = vmatpush3.bf16.msra.mxu1 %v3347_v31 }
   0xf   :  { %3167 = vmatprep.subr.bf16.mxu1 %v3351_v34 }
  0x11   :  { %295 = vmatpush1.bf16.msra.mxu0 %v3348_v32 }
  0x12   :  { %296 = vmatprep.subr.bf16.mxu0 %v3349_v33  ;;  %3168 = vmatpush3.bf16.msra.mxu1 %v3351_v34 }
  0x13   :  { %3169 = vmatprep.subr.bf16.mxu1 %v3355_v37 }
  0x15   :  { %297 = vmatpush1.bf16.msra.mxu0 %v3352_v35 }
  0x16   :  { %298 = vmatprep.subr.bf16.mxu0 %v3353_v36  ;;  %3170 = vmatpush3.bf16.msra.mxu1 %v3355_v37 }
  0x17   :  { %3171 = vmatprep.subr.bf16.mxu1 %v3359_v40 }
  0x19   :  { %299 = vmatpush1.bf16.msra.mxu0 %v3356_v38 }
  0x1a   :  { %300 = vmatprep.subr.bf16.mxu0 %v3357_v39  ;;  %3172 = vmatpush3.bf16.msra.mxu1 %v3359_v40  ;;  %v396_v40 = vlaneseq }
  0x1b   :  { %3173 = vmatprep.subr.bf16.mxu1 %v3363_v44 }
  0x1d   :  { %301 = vmatpush1.bf16.msra.mxu0 %v3360_v42  ;;  %v3867_v42 = vshrl.u32 %v396_v40, 7 }
  0x1e   :  { %302 = vmatprep.subr.bf16.mxu0 %v3361_v43  ;;  %3174 = vmatpush3.bf16.msra.mxu1 %v3363_v44  ;;  %v400_v43 = vand.u32 127, %v396_v40 }
  0x1f   :  { %3175 = vmatprep.subr.bf16.mxu1 %v3365_v46  ;;  %v398_v44 = vadd.s32 8, %v3867_v42 }
  0x20   :  { %vm401_vm2 = vcmp.le.s32.totalorder %v400_v43, %v3867_v42 }
  0x21   :  { %303 = vmatpush1.bf16.msra.mxu0 %v3364_v45  ;;  %vm402_vm3 = vcmp.le.s32.totalorder %v400_v43, %v398_v44 }
  0x22   :  { %3176 = vmatpush3.bf16.msra.mxu1 %v3365_v46  ;;  %v3625_v46 = vmov -1e+30  }
  0x91   :  { %v62_v10 = vpop.xlane.xlu0 %61  ;;  %v66_v11 = vpop.xlane.xlu1 %65 }
  0x92   :  { %v70_v12 = vmul.f32 0.0078125, %v62_v10  ;;  %v72_v13 = vmul.f32 0.0078125, %v66_v11 }
  0x94   :  { %v3740_v14 = vsub.f32 %v3715_v2, %v70_v12  ;;  %v3743_v15 = vsub.f32 %v3717_v3, %v72_v13 }
  0x95   :  { %v64_v16 = vpop.xlane.xlu0 %63  ;;  %v68_v17 = vpop.xlane.xlu1 %67 }
  0x96   :  { %v71_v18 = vmul.f32 0.0078125, %v64_v16  ;;  %v78_v19 = vmul.f32 %v3740_v14, %v3740_v14  ;;  %v73_v20 = vmul.f32 0.0078125, %v68_v17  ;;  %v80_v23 = vmul.f32 %v3743_v15, %v3743_v15 }
  0x98   :  { %v3748_v21 = vsub.f32 %v3721_v4, %v71_v18  ;;  %82 = vadd.xlane.f32.xlu0 %v78_v19  ;;  %v3751_v22 = vsub.f32 %v3723_v5, %v73_v20  ;;  %v3623_v20 = vmov 0.0  }
  0x99   :  { %3181 = vmatprep.subr.bf16.mxu0 %v3623_v20  ;;  %3193 = vmatprep.subr.bf16.mxu1 %v3623_v20 }
  0x9a   :  { %v79_v24 = vmul.f32 %v3748_v21, %v3748_v21  ;;  %v81_v25 = vmul.f32 %v3751_v22, %v3751_v22 }
  0x9c   :  { %86 = vadd.xlane.f32.xlu0 %v80_v23  ;;  %84 = vadd.xlane.f32.xlu1 %v79_v24 }
  0xa0   :  { %88 = vadd.xlane.f32.xlu1 %v81_v25 }
 0x125   :  { %v83_v47 = vpop.xlane.xlu0 %82 }
 0x126   :  { %v90_v48 = vmul.f32 0.0078125, %v83_v47  ;;  %v3871_v47 = vsel %vm401_vm2, 0.0, %v3625_v46 }
 0x128   :  { %v94_v49 = vadd.f32 1e-05, %v90_v48 }
 0x129   :  { %v85_v50 = vpop.xlane.xlu1 %84  ;;  %v87_v51 = vpop.xlane.xlu0 %86 }
 0x12a   :  { %3502 = vrsqrt.f32 %v94_v49  ;;  %v91_v52 = vmul.f32 0.0078125, %v85_v50  ;;  %v92_v53 = vmul.f32 0.0078125, %v87_v51  ;;  %v3873_v51 = vsel %vm402_vm3, 0.0, %v3625_v46 }
 0x12c   :  { %v95_v54 = vadd.f32 1e-05, %v91_v52  ;;  %v96_v55 = vadd.f32 1e-05, %v92_v53 }
 0x12d   :  { %v89_v56 = vpop.xlane.xlu1 %88 }
 0x12e   :  { %3504 = vrsqrt.f32 %v95_v54  ;;  %v93_v57 = vmul.f32 0.0078125, %v89_v56 }
 0x12f   :  { %3506 = vrsqrt.f32 %v96_v55 }
 0x130   :  { %v97_v58 = vadd.f32 1e-05, %v93_v57 }
 0x132   :  { %3508 = vrsqrt.f32 %v97_v58 }
 0x134   :  { %v3503_v59 = vpop.eup %3502 }
 0x135   :  { %v102_v60 = vmul.f32 %v3503_v59, %v3740_v14 }
 0x137   :  { %v112_v1 = vmul.f32 %v2893_v61, %v102_v60 }
 0x138   :  { %v3505_v62 = vpop.eup %3504 }
 0x139   :  { %v3507_v63 = vpop.eup %3506  ;;  %v103_v0 = vmul.f32 %v3505_v62, %v3748_v21  ;;  %v122_v10 = vadd.f32 %v2894_v6, %v112_v1 }
 0x13a   :  { %v104_v7 = vmul.f32 %v3507_v63, %v3743_v15 }
 0x13b   :  { %v113_v8 = vmul.f32 %v2893_v61, %v103_v0 }
 0x13c   :  { %v3509_v9 = vpop.eup %3508  ;;  %v114_v13 = vmul.f32 %v2893_v61, %v104_v7 }
 0x13d   :  { %v123_v11 = vadd.f32 %v2894_v6, %v113_v8  ;;  %v105_v12 = vmul.f32 %v3509_v9, %v3751_v22 }
 0x13e   :  { %v124_v17 = vadd.f32 %v2894_v6, %v114_v13 }
 0x13f   :  { %v126_v14 = vpack.c.bf16 %v123_v11, %v122_v10  ;;  %v115_v16 = vmul.f32 %v2893_v61, %v105_v12 }
 0x141   :  { %321 = vmatmul.mubr.bf16.vlgmr.msra.gmra.mrb[0].mxu0 %v126_v14  ;;  %3177 = vmatprep.mubr.bf16.mxu1 %v126_v14  ;;  %v125_v18 = vadd.f32 %v2894_v6, %v115_v16 }
 0x142   :  { %330 = vmatprep.mubr.bf16.mxu0 %v3622_v41 }
 0x143   :  { %v127_v19 = vpack.c.bf16 %v125_v18, %v124_v17 }
 0x145   :  { %3178 = vmatmul.mubr.bf16.vlgmr.msra.gmra.mrb[0].mxu1 %v127_v19 }
 0x146   :  { %3195 = vmatprep.mubr.msk.bf16.mxu1 %vm3624_vm0, %v3623_v20 }
 0x149   :  { %331 = vmatmul.mubr.bf16.gmra.mrb[4].mxu0 %v127_v19 }
 0x14a   :  { %3183 = vmatprep.mubr.msk.bf16.mxu0 %vm3624_vm0, %v3623_v20 }
 0x214   :  { %v322_v15 = vpop.f32.mrb[0].mxu0 }
 0x215   :  { %v324_v21 = vpop.f32.mrb[1].mxu0 }
 0x216   :  { %v326_v22 = vpop.f32.mrb[2].mxu0 }
 0x217   :  { %v3837_v23 = vpack.c.bf16 %v326_v22, %v322_v15  ;;  %v328_v24 = vpop.f32.mrb[3].mxu0 }
 0x218   :  { %v3839_v25 = vpack.c.bf16 %v328_v24, %v324_v21  ;;  %v3179_v26 = vpop.f32.mrb[0].mxu1 }
 0x219   :  { %v375_v27 = vpop.f32.mrb[1].mxu1 }
 0x21a   :  { %v3180_v28 = vpop.f32.mrb[2].mxu1  ;;  %v410_v29 = vsel %vm405_vm1, %v3839_v25, 0 }
 0x21b   :  { %v3843_v30 = vpack.c.bf16 %v3180_v28, %v3179_v26  ;;  %v378_v31 = vpop.f32.mrb[3].mxu1  ;;  %3182 = vmatpush3.bf16.xpose.msra.mxu0 %v410_v29 }
 0x21c   :  { %v3845_v32 = vpack.c.bf16 %v378_v31, %v375_v27  ;;  %v332_v33 = vpop.f32.mrb[4].mxu0  ;;  %3187 = vmatprep.subr.bf16.mxu0 %v3623_v20 }
 0x21d   :  { %v334_v34 = vpop.f32.mrb[5].mxu0 }
 0x21e   :  { %v336_v35 = vpop.f32.mrb[6].mxu0  ;;  %3194 = vmatpush3.bf16.msra.mxu1 %v3845_v32 }
 0x21f   :  { %v3849_v36 = vpack.c.bf16 %v336_v35, %v332_v33  ;;  %v338_v37 = vpop.f32.mrb[7].mxu0  ;;  %3205 = vmatprep.subr.bf16.mxu1 %v3623_v20 }
 0x220   :  { %v3852_v38 = vpack.c.bf16 %v338_v37, %v334_v34 }
 0x222   :  { %3184 = vmatmul.mubr.msk.bf16.vlgmr.msra.gmra.mrb[8].mxu0 %vm405_vm1, %v3837_v23  ;;  %v457_v39 = vsel %vm405_vm1, %v3852_v38, 0 }
 0x223   :  { %3188 = vmatpush3.bf16.xpose.msra.mxu0 %v457_v39  ;;  %3189 = vmatprep.mubr.msk.bf16.mxu0 %vm3624_vm0, %v3623_v20 }
 0x224   :  { %3199 = vmatprep.subr.bf16.mxu0 %v3623_v20 }
 0x22a   :  { %3190 = vmatmul.mubr.msk.bf16.vlgmr.msra.gmra.mrb[12].mxu0 %vm405_vm1, %v3849_v36 }
 0x22b   :  { %3200 = vmatpush3.bf16.msra.mxu0 %v3843_v30  ;;  %3201 = vmatprep.mubr.msk.bf16.mxu0 %vm3624_vm0, %v3623_v20 }
 0x22c   :  { %3211 = vmatprep.subr.bf16.mxu0 %v3623_v20 }
 0x2f5   :  { %v446_v45 = vpop.f32.mrb[8].mxu0 }
 0x2f6   :  { %v500_v48 = vmul.f32 0.17677669, %v446_v45  ;;  %v3185_v49 = vpop.f32.mrb[9].mxu0 }
 0x2f7   :  { %v449_v50 = vpop.f32.mrb[10].mxu0 }
 0x2f8   :  { %v501_v52 = vmul.f32 0.17677669, %v449_v50  ;;  %v3186_v53 = vpop.f32.mrb[11].mxu0  ;;  %v504_v54 = vadd.f32 %v500_v48, %v3871_v47 }
 0x2fa   :  { %v509_v55 = vsel %vm508_vm4, %v504_v54, -inf  ;;  %v505_v56 = vadd.f32 %v501_v52, %v3873_v51 }
 0x2fb   :  { %510 = vmax.xlane.f32.xlu0 %v509_v55 }
 0x2fc   :  { %v512_v57 = vsel %vm508_vm4, %v505_v56, -inf }
 0x2fd   :  { %513 = vmax.xlane.f32.xlu1 %v512_v57  ;;  %v493_v58 = vpop.f32.mrb[12].mxu0 }
 0x2fe   :  { %v502_v59 = vmul.f32 0.17677669, %v493_v58  ;;  %v3191_v60 = vpop.f32.mrb[13].mxu0 }
 0x2ff   :  { %v496_v61 = vpop.f32.mrb[14].mxu0 }
 0x300   :  { %v503_v62 = vmul.f32 0.17677669, %v496_v61  ;;  %v3192_v63 = vpop.f32.mrb[15].mxu0  ;;  %v506_v0 = vadd.f32 %v502_v59, %v3871_v47 }
 0x302   :  { %v515_v1 = vsel %vm508_vm4, %v506_v0, -inf  ;;  %v507_v6 = vadd.f32 %v503_v62, %v3873_v51 }
 0x303   :  { %516 = vmax.xlane.f32.xlu0 %v515_v1 }
 0x304   :  { %v518_v7 = vsel %vm508_vm4, %v507_v6, -inf }
 0x305   :  { %519 = vmax.xlane.f32.xlu1 %v518_v7 }
 0x388   :  { %v511_v8 = vpop.xlane.xlu0 %510 }
 0x389   :  { %v521_v9 = vsub.f32 %v504_v54, %v511_v8 }
 0x38a   :  { %v514_v10 = vpop.xlane.xlu1 %513 }
 0x38b   :  { %v525_v11 = vmul.f32 1.442695, %v521_v9  ;;  %v522_v12 = vsub.f32 %v505_v56, %v514_v10 }
 0x38d   :  { %3510 = vpow2.f32 %v525_v11  ;;  %v527_v13 = vmul.f32 1.442695, %v522_v12 }
 0x38f   :  { %3512 = vpow2.f32 %v527_v13 }
 0x390   :  { %v517_v14 = vpop.xlane.xlu0 %516 }
 0x391   :  { %v523_v16 = vsub.f32 %v506_v0, %v517_v14 }
 0x392   :  { %v520_v26 = vpop.xlane.xlu1 %519 }
 0x393   :  { %v529_v17 = vmul.f32 1.442695, %v523_v16  ;;  %v524_v27 = vsub.f32 %v507_v6, %v520_v26 }
 0x395   :  { %3514 = vpow2.f32 %v529_v17  ;;  %v531_v28 = vmul.f32 1.442695, %v524_v27 }
 0x397   :  { %v3511_v18 = vpop.eup %3510  ;;  %3516 = vpow2.f32 %v531_v28 }
 0x398   :  { %v533_v19 = vsel %vm508_vm4, %v3511_v18, 0.0 }
 0x399   :  { %v3513_v15 = vpop.eup %3512  ;;  %534 = vadd.xlane.f32.xlu0 %v533_v19 }
 0x39a   :  { %v536_v21 = vsel %vm508_vm4, %v3513_v15, 0.0 }
 0x39b   :  { %537 = vadd.xlane.f32.xlu1 %v536_v21 }
 0x39f   :  { %v3515_v22 = vpop.eup %3514 }
 0x3a0   :  { %v539_v24 = vsel %vm508_vm4, %v3515_v22, 0.0 }
 0x3a1   :  { %540 = vadd.xlane.f32.xlu0 %v539_v24  ;;  %v3517_v29 = vpop.eup %3516 }
 0x3a2   :  { %v542_v31 = vsel %vm508_vm4, %v3517_v29, 0.0 }
 0x3ac   :  { %700 = vrot.lane.b32.xlu1 %v3852_v38, %s3626_s1 }
 0x3b7   :  { %647 = vrot.lane.b32.xlu0 %v3839_v25, %s3626_s1 }
 0x3d0   :  { %543 = vadd.xlane.f32.xlu1 %v542_v31 }
 0x3e1   :  { %644 = vrot.lane.b32.xlu1 %v3837_v23, %s3626_s1 }
 0x3e5   :  { %697 = vrot.lane.b32.xlu1 %v3849_v36, %s3626_s1 }
 0x426   :  { %v535_v33 = vpop.xlane.xlu0 %534 }
 0x427   :  { %3518 = vrcp.f32 %v535_v33 }
 0x428   :  { %v538_v34 = vpop.xlane.xlu1 %537 }
 0x429   :  { %3520 = vrcp.f32 %v538_v34 }
 0x42c   :  { %v701_v48 = vpop.permute.xlu1 %700 }
 0x42d   :  { %v706_v57 = vsel %vm405_vm1, %v701_v48, 0 }
 0x42e   :  { %v541_v35 = vpop.xlane.xlu0 %540 }
 0x42f   :  { %3522 = vrcp.f32 %v541_v35 }
 0x431   :  { %v3519_v37 = vpop.eup %3518 }
 0x432   :  { %v549_v40 = vmul.f32 %v3519_v37, %v3511_v18  ;;  %v648_v44 = vpop.permute.xlu0 %647 }
 0x433   :  { %v3521_v39 = vpop.eup %3520  ;;  %v653_v46 = vsel %vm405_vm1, %v648_v44, 0 }
 0x434   :  { %v550_v43 = vmul.f32 %v3521_v39, %v3513_v15 }
 0x436   :  { %v553_v45 = vpack.c.bf16 %v550_v43, %v549_v40 }
 0x438   :  { %3196 = vmatmul.mubr.msk.bf16.vlgmr.msra.gmra.mrb[4].mxu1 %vm508_vm4, %v553_v45 }
 0x439   :  { %3206 = vmatpush3.bf16.xpose.msra.mxu1 %v653_v46  ;;  %3207 = vmatprep.mubr.msk.bf16.mxu1 %vm3624_vm0, %v3623_v20  ;;  %v3523_v52 = vpop.eup %3522 }
 0x43a   :  { %3217 = vmatprep.subr.bf16.mxu1 %v3623_v20  ;;  %v551_v54 = vmul.f32 %v3523_v52, %v3515_v22 }
 0x45d   :  { %v544_v49 = vpop.xlane.xlu1 %543 }
 0x45e   :  { %3524 = vrcp.f32 %v544_v49 }
 0x461   :  { %v645_v50 = vpop.permute.xlu1 %644 }
 0x462   :  { %3208 = vmatmul.mubr.msk.bf16.vlgmr.msra.gmra.mrb[8].mxu1 %vm405_vm1, %v645_v50 }
 0x463   :  { %3219 = vmatprep.mubr.msk.bf16.mxu1 %vm3624_vm0, %v3623_v20 }
 0x465   :  { %v698_v58 = vpop.permute.xlu1 %697 }
 0x468   :  { %v3525_v53 = vpop.eup %3524 }
 0x469   :  { %v552_v55 = vmul.f32 %v3525_v53, %v3517_v29 }
 0x46b   :  { %v554_v56 = vpack.c.bf16 %v552_v55, %v551_v54 }
 0x46d   :  { %3202 = vmatmul.mubr.msk.bf16.vlgmr.msra.gmra.mrb[16].mxu0 %vm508_vm4, %v554_v56 }
 0x46e   :  { %3212 = vmatpush3.bf16.xpose.msra.mxu0 %v706_v57  ;;  %3213 = vmatprep.mubr.msk.bf16.mxu0 %vm3624_vm0, %v3623_v20 }
 0x46f   :  { %3223 = vmatprep.subr.bf16.mxu0 %v3623_v20 }
 0x475   :  { %3214 = vmatmul.mubr.msk.bf16.vlgmr.msra.gmra.mrb[20].mxu0 %vm405_vm1, %v698_v58 }
 0x476   :  { %3225 = vmatprep.mubr.msk.bf16.mxu0 %vm3624_vm0, %v3623_v20 }
 0x50b   :  { %v3911_v59 = vpop.f32.mrb[4].mxu1 }
 0x50c   :  { %v3197_v60 = vpop.f32.mrb[5].mxu1 }
 0x50d   :  { %v3913_v61 = vpop.f32.mrb[6].mxu1 }
 0x50e   :  { %v3198_v62 = vpop.f32.mrb[7].mxu1 }
 0x535   :  { %v689_v63 = vpop.f32.mrb[8].mxu1 }
 0x536   :  { %v749_v0 = vmul.f32 0.17677669, %v689_v63  ;;  %v3209_v1 = vpop.f32.mrb[9].mxu1 }
 0x537   :  { %v692_v6 = vpop.f32.mrb[10].mxu1 }
 0x538   :  { %v750_v7 = vmul.f32 0.17677669, %v692_v6  ;;  %v3210_v8 = vpop.f32.mrb[11].mxu1  ;;  %v753_v9 = vadd.f32 %v749_v0, %v3871_v47 }
 0x53a   :  { %v757_v10 = vsel %vm508_vm4, %v753_v9, -inf  ;;  %v754_v11 = vadd.f32 %v750_v7, %v3873_v51 }
 0x53b   :  { %758 = vmax.xlane.f32.xlu0 %v757_v10 }
 0x53c   :  { %v760_v12 = vsel %vm508_vm4, %v754_v11, -inf }
 0x53d   :  { %761 = vmax.xlane.f32.xlu1 %v760_v12 }
 0x540   :  { %v3919_v13 = vpop.f32.mrb[16].mxu0 }
 0x541   :  { %v3203_v14 = vpop.f32.mrb[17].mxu0 }
 0x542   :  { %v3921_v16 = vpop.f32.mrb[18].mxu0 }
 0x543   :  { %v3204_v17 = vpop.f32.mrb[19].mxu0 }
 0x548   :  { %v742_v18 = vpop.f32.mrb[20].mxu0 }
 0x549   :  { %v751_v19 = vmul.f32 0.17677669, %v742_v18  ;;  %v3215_v15 = vpop.f32.mrb[21].mxu0 }
 0x54a   :  { %v745_v21 = vpop.f32.mrb[22].mxu0 }
 0x54b   :  { %v752_v22 = vmul.f32 0.17677669, %v745_v21  ;;  %v3216_v24 = vpop.f32.mrb[23].mxu0  ;;  %v755_v26 = vadd.f32 %v751_v19, %v3871_v47 }
 0x54d   :  { %v763_v27 = vsel %vm508_vm4, %v755_v26, -inf  ;;  %v756_v28 = vadd.f32 %v752_v22, %v3873_v51 }
 0x54e   :  { %764 = vmax.xlane.f32.xlu0 %v763_v27 }
 0x54f   :  { %v766_v29 = vsel %vm508_vm4, %v756_v28, -inf }
 0x552   :  { %767 = vmax.xlane.f32.xlu0 %v766_v29 }
 0x5c8   :  { %v759_v31 = vpop.xlane.xlu0 %758 }
 0x5c9   :  { %v769_v33 = vsub.f32 %v753_v9, %v759_v31 }
 0x5ca   :  { %v762_v34 = vpop.xlane.xlu1 %761 }
 0x5cb   :  { %v773_v35 = vmul.f32 1.442695, %v769_v33  ;;  %v770_v37 = vsub.f32 %v754_v11, %v762_v34 }
 0x5cd   :  { %3526 = vpow2.f32 %v773_v35  ;;  %v775_v39 = vmul.f32 1.442695, %v770_v37 }
 0x5cf   :  { %3528 = vpow2.f32 %v775_v39 }
 0x5d7   :  { %v3527_v40 = vpop.eup %3526 }
 0x5d8   :  { %v781_v43 = vsel %vm508_vm4, %v3527_v40, 0.0 }
 0x5d9   :  { %v3529_v44 = vpop.eup %3528  ;;  %782 = vadd.xlane.f32.xlu0 %v781_v43 }
 0x5da   :  { %v784_v45 = vsel %vm508_vm4, %v3529_v44, 0.0 }
 0x5db   :  { %785 = vadd.xlane.f32.xlu1 %v784_v45  ;;  %v765_v46 = vpop.xlane.xlu0 %764 }
 0x5dc   :  { %v771_v48 = vsub.f32 %v755_v26, %v765_v46 }
 0x5de   :  { %v777_v49 = vmul.f32 1.442695, %v771_v48 }
 0x5df   :  { %v768_v53 = vpop.xlane.xlu0 %767 }
 0x5e0   :  { %3530 = vpow2.f32 %v777_v49  ;;  %v772_v54 = vsub.f32 %v756_v28, %v768_v53 }
 0x5e2   :  { %v779_v55 = vmul.f32 1.442695, %v772_v54 }
 0x5e4   :  { %3532 = vpow2.f32 %v779_v55 }
 0x5ea   :  { %v3531_v50 = vpop.eup %3530 }
 0x5eb   :  { %v787_v52 = vsel %vm508_vm4, %v3531_v50, 0.0 }
 0x5ec   :  { %852 = vrot.lane.b32.xlu1 %v3843_v30, %s3626_s1  ;;  %788 = vadd.xlane.f32.xlu0 %v787_v52 }
 0x5ee   :  { %v3533_v56 = vpop.eup %3532 }
 0x5ef   :  { %v790_v57 = vsel %vm508_vm4, %v3533_v56, 0.0 }
 0x5f0   :  { %901 = vrot.lane.b32.xlu1 %v3839_v25, %s3627_s2 }
 0x602   :  { %804 = vrot.lane.b32.xlu0 %v3845_v32, %s3626_s1 }
 0x606   :  { %899 = vrot.lane.b32.xlu0 %v3837_v23, %s3627_s2 }
 0x614   :  { %791 = vadd.xlane.f32.xlu1 %v790_v57 }
 0x625   :  { %952 = vrot.lane.b32.xlu1 %v3852_v38, %s3627_s2 }
 0x629   :  { %950 = vrot.lane.b32.xlu1 %v3849_v36, %s3627_s2 }
 0x666   :  { %v783_v62 = vpop.xlane.xlu0 %782 }
 0x668   :  { %v786_v58 = vpop.xlane.xlu1 %785 }
 0x669   :  { %3534 = vrcp.f32 %v786_v58 }
 0x66a   :  { %3536 = vrcp.f32 %v783_v62 }
 0x66c   :  { %v853_v60 = vpop.permute.xlu1 %852 }
 0x66d   :  { %3224 = vmatpush3.bf16.msra.mxu0 %v853_v60 }
 0x66e   :  { %3235 = vmatprep.subr.bf16.mxu0 %v3623_v20 }
 0x670   :  { %v902_v10 = vpop.permute.xlu1 %901 }
 0x671   :  { %v907_v11 = vsel %vm405_vm1, %v902_v10, 0 }
 0x673   :  { %v3535_v63 = vpop.eup %3534 }
 0x674   :  { %v3537_v1 = vpop.eup %3536  ;;  %v798_v6 = vmul.f32 %v3535_v63, %v3529_v44 }
 0x675   :  { %v797_v7 = vmul.f32 %v3537_v1, %v3527_v40 }
 0x677   :  { %v801_v9 = vpack.c.bf16 %v798_v6, %v797_v7 }
 0x679   :  { %v789_v0 = vpop.xlane.xlu0 %788 }
 0x67a   :  { %3538 = vrcp.f32 %v789_v0 }
 0x67d   :  { %v805_v8 = vpop.permute.xlu0 %804 }
 0x67e   :  { %3218 = vmatpush3.bf16.msra.mxu1 %v805_v8 }
 0x67f   :  { %3229 = vmatprep.subr.bf16.mxu1 %v3623_v20 }
 0x681   :  { %3220 = vmatmul.mubr.msk.bf16.vlgmr.msra.gmra.mrb[12].mxu1 %vm508_vm4, %v801_v9  ;;  %v900_v12 = vpop.permute.xlu0 %899 }
 0x682   :  { %3231 = vmatprep.mubr.msk.bf16.mxu1 %vm3624_vm0, %v3623_v20 }
 0x684   :  { %v3539_v17 = vpop.eup %3538 }
 0x685   :  { %v799_v19 = vmul.f32 %v3539_v17, %v3531_v50 }
 0x687   :  { %3230 = vmatpush3.bf16.xpose.msra.mxu1 %v907_v11 }
 0x688   :  { %3241 = vmatprep.subr.bf16.mxu1 %v3623_v20 }
 0x68e   :  { %3232 = vmatmul.mubr.msk.bf16.vlgmr.msra.gmra.mrb[16].mxu1 %vm405_vm1, %v900_v12 }
 0x68f   :  { %3243 = vmatprep.mubr.msk.bf16.mxu1 %vm3624_vm0, %v3623_v20 }
 0x6a1   :  { %v792_v14 = vpop.xlane.xlu1 %791 }
 0x6a2   :  { %3540 = vrcp.f32 %v792_v14 }
 0x6a5   :  { %v953_v21 = vpop.permute.xlu1 %952 }
 0x6a6   :  { %v958_v24 = vsel %vm405_vm1, %v953_v21, 0 }
 0x6a9   :  { %v951_v26 = vpop.permute.xlu1 %950 }
 0x6ac   :  { %v3541_v18 = vpop.eup %3540 }
 0x6ad   :  { %v800_v15 = vmul.f32 %v3541_v18, %v3533_v56 }
 0x6af   :  { %v802_v22 = vpack.c.bf16 %v800_v15, %v799_v19 }
 0x6b1   :  { %3226 = vmatmul.mubr.msk.bf16.vlgmr.msra.gmra.mrb[24].mxu0 %vm508_vm4, %v802_v22 }
 0x6b2   :  { %3236 = vmatpush3.bf16.xpose.msra.mxu0 %v958_v24  ;;  %3237 = vmatprep.mubr.msk.bf16.mxu0 %vm3624_vm0, %v3623_v20 }
 0x6b3   :  { %3247 = vmatprep.subr.bf16.mxu0 %v3623_v20 }
 0x6b9   :  { %3238 = vmatmul.mubr.msk.bf16.vlgmr.msra.gmra.mrb[28].mxu0 %vm405_vm1, %v951_v26 }
 0x6ba   :  { %3249 = vmatprep.mubr.msk.bf16.mxu0 %vm3624_vm0, %v3623_v20 }
 0x754   :  { %v3961_v27 = vpop.f32.mrb[12].mxu1 }
 0x755   :  { %v3221_v28 = vpop.f32.mrb[13].mxu1 }
 0x756   :  { %v3963_v29 = vpop.f32.mrb[14].mxu1 }
 0x757   :  { %v3304_v31 = vpack.i.bf16 %v3963_v29, %v3961_v27  ;;  %v3222_v33 = vpop.f32.mrb[15].mxu1 }
 0x761   :  { %v943_v34 = vpop.f32.mrb[16].mxu1 }
 0x762   :  { %v1001_v35 = vmul.f32 0.17677669, %v943_v34  ;;  %v3233_v37 = vpop.f32.mrb[17].mxu1 }
 0x763   :  { %v946_v39 = vpop.f32.mrb[18].mxu1 }
 0x764   :  { %v1002_v40 = vmul.f32 0.17677669, %v946_v39  ;;  %v3234_v43 = vpop.f32.mrb[19].mxu1  ;;  %v1005_v44 = vadd.f32 %v1001_v35, %v3871_v47 }
 0x766   :  { %v1009_v45 = vsel %vm508_vm4, %v1005_v44, -inf  ;;  %v1006_v46 = vadd.f32 %v1002_v40, %v3873_v51 }
 0x767   :  { %1010 = vmax.xlane.f32.xlu0 %v1009_v45 }
 0x768   :  { %v1012_v48 = vsel %vm508_vm4, %v1006_v46, -inf }
 0x769   :  { %1013 = vmax.xlane.f32.xlu1 %v1012_v48 }
 0x784   :  { %v3971_v49 = vpop.f32.mrb[24].mxu0 }
 0x785   :  { %v3227_v50 = vpop.f32.mrb[25].mxu0 }
 0x786   :  { %v3973_v52 = vpop.f32.mrb[26].mxu0 }
 0x787   :  { %v3309_v53 = vpack.i.bf16 %v3973_v52, %v3971_v49  ;;  %v3228_v54 = vpop.f32.mrb[27].mxu0 }
 0x78c   :  { %v994_v55 = vpop.f32.mrb[28].mxu0 }
 0x78d   :  { %v1003_v56 = vmul.f32 0.17677669, %v994_v55  ;;  %v3239_v57 = vpop.f32.mrb[29].mxu0 }
 0x78e   :  { %v997_v58 = vpop.f32.mrb[30].mxu0 }
 0x78f   :  { %v1004_v60 = vmul.f32 0.17677669, %v997_v58  ;;  %v3240_v62 = vpop.f32.mrb[31].mxu0  ;;  %v1007_v63 = vadd.f32 %v1003_v56, %v3871_v47 }
 0x791   :  { %v1015_v0 = vsel %vm508_vm4, %v1007_v63, -inf  ;;  %v1008_v1 = vadd.f32 %v1004_v60, %v3873_v51 }
 0x792   :  { %1016 = vmax.xlane.f32.xlu0 %v1015_v0 }
 0x793   :  { %v1018_v6 = vsel %vm508_vm4, %v1008_v1, -inf }
 0x796   :  { %1019 = vmax.xlane.f32.xlu0 %v1018_v6 }
 0x7f4   :  { %v1011_v7 = vpop.xlane.xlu0 %1010 }
 0x7f5   :  { %v1021_v8 = vsub.f32 %v1005_v44, %v1011_v7 }
 0x7f6   :  { %v1014_v9 = vpop.xlane.xlu1 %1013 }
 0x7f7   :  { %v1025_v10 = vmul.f32 1.442695, %v1021_v8  ;;  %v1022_v11 = vsub.f32 %v1006_v46, %v1014_v9 }
 0x7f9   :  { %3542 = vpow2.f32 %v1025_v10  ;;  %v1027_v12 = vmul.f32 1.442695, %v1022_v11 }
 0x7fb   :  { %3544 = vpow2.f32 %v1027_v12 }
 0x803   :  { %v3543_v14 = vpop.eup %3542 }
 0x804   :  { %v1033_v17 = vsel %vm508_vm4, %v3543_v14, 0.0 }
 0x805   :  { %v3545_v18 = vpop.eup %3544  ;;  %1034 = vadd.xlane.f32.xlu0 %v1033_v17 }
 0x806   :  { %v1036_v19 = vsel %vm508_vm4, %v3545_v18, 0.0 }
 0x807   :  { %1037 = vadd.xlane.f32.xlu1 %v1036_v19 }
 0x818   :  { %1102 = vrot.lane.b32.xlu1 %v3843_v30, %s3627_s2 }
 0x81c   :  { %1151 = vrot.lane.b32.xlu1 %v3839_v25, %s3628_s24 }
 0x81f   :  { %v1017_v15 = vpop.xlane.xlu0 %1016 }
 0x820   :  { %v1023_v21 = vsub.f32 %v1007_v63, %v1017_v15 }
 0x822   :  { %v1029_v22 = vmul.f32 1.442695, %v1023_v21 }
 0x823   :  { %v1020_v24 = vpop.xlane.xlu0 %1019 }
 0x824   :  { %3546 = vpow2.f32 %v1029_v22  ;;  %v1024_v26 = vsub.f32 %v1008_v1, %v1020_v24 }
 0x826   :  { %v1031_v33 = vmul.f32 1.442695, %v1024_v26 }
 0x828   :  { %3548 = vpow2.f32 %v1031_v33 }
 0x82e   :  { %v3547_v28 = vpop.eup %3546 }
 0x82f   :  { %v1039_v34 = vsel %vm508_vm4, %v3547_v28, 0.0 }
 0x830   :  { %1040 = vadd.xlane.f32.xlu0 %v1039_v34 }
 0x832   :  { %v3549_v35 = vpop.eup %3548 }
 0x833   :  { %v1042_v37 = vsel %vm508_vm4, %v3549_v35, 0.0 }
 0x840   :  { %1043 = vadd.xlane.f32.xlu1 %v1042_v37 }
 0x846   :  { %1055 = vrot.lane.b32.xlu0 %v3845_v32, %s3627_s2 }
 0x84a   :  { %1149 = vrot.lane.b32.xlu0 %v3837_v23, %s3628_s24 }
 0x851   :  { %1202 = vrot.lane.b32.xlu1 %v3852_v38, %s3628_s24 }
 0x855   :  { %1200 = vrot.lane.b32.xlu1 %v3849_v36, %s3628_s24 }
 0x892   :  { %v1035_v40 = vpop.xlane.xlu0 %1034 }
 0x894   :  { %v1038_v25 = vpop.xlane.xlu1 %1037 }
 0x895   :  { %3550 = vrcp.f32 %v1038_v25 }
 0x896   :  { %3552 = vrcp.f32 %v1035_v40 }
 0x898   :  { %v1103_v39 = vpop.permute.xlu1 %1102 }
 0x899   :  { %3248 = vmatpush3.bf16.msra.mxu0 %v1103_v39 }
 0x89a   :  { %3259 = vmatprep.subr.bf16.mxu0 %v3623_v20 }
 0x89c   :  { %v1152_v36 = vpop.permute.xlu1 %1151 }
 0x89d   :  { %v1157_v38 = vsel %vm405_vm1, %v1152_v36, 0 }
 0x89f   :  { %v3551_v43 = vpop.eup %3550 }
 0x8a0   :  { %v3553_v45 = vpop.eup %3552  ;;  %v1050_v46 = vmul.f32 %v3551_v43, %v3545_v18 }
 0x8a1   :  { %v1049_v48 = vmul.f32 %v3553_v45, %v3543_v14 }
 0x8a3   :  { %v1053_v50 = vpack.c.bf16 %v1050_v46, %v1049_v48 }
 0x8bd   :  { %v1041_v44 = vpop.xlane.xlu0 %1040 }
 0x8be   :  { %3554 = vrcp.f32 %v1041_v44 }
 0x8c1   :  { %v1056_v23 = vpop.permute.xlu0 %1055 }
 0x8c2   :  { %3242 = vmatpush3.bf16.msra.mxu1 %v1056_v23 }
 0x8c3   :  { %3253 = vmatprep.subr.bf16.mxu1 %v3623_v20 }
 0x8c5   :  { %3244 = vmatmul.mubr.msk.bf16.vlgmr.msra.gmra.mrb[20].mxu1 %vm508_vm4, %v1053_v50  ;;  %v1150_v55 = vpop.permute.xlu0 %1149 }
 0x8c6   :  { %3255 = vmatprep.mubr.msk.bf16.mxu1 %vm3624_vm0, %v3623_v20 }
 0x8c8   :  { %v3555_v56 = vpop.eup %3554 }
 0x8c9   :  { %v1051_v58 = vmul.f32 %v3555_v56, %v3547_v28 }
 0x8cb   :  { %3254 = vmatpush3.bf16.xpose.msra.mxu1 %v1157_v38 }
 0x8cc   :  { %3265 = vmatprep.subr.bf16.mxu1 %v3623_v20 }
 0x8cd   :  { %v1044_v54 = vpop.xlane.xlu1 %1043 }
 0x8ce   :  { %3556 = vrcp.f32 %v1044_v54 }
 0x8d1   :  { %v1203_v62 = vpop.permute.xlu1 %1202 }
 0x8d2   :  { %3256 = vmatmul.mubr.msk.bf16.vlgmr.msra.gmra.mrb[24].mxu1 %vm405_vm1, %v1150_v55  ;;  %v1208_v0 = vsel %vm405_vm1, %v1203_v62, 0 }
 0x8d3   :  { %3267 = vmatprep.mubr.msk.bf16.mxu1 %vm3624_vm0, %v3623_v20 }
 0x8d5   :  { %v1201_v1 = vpop.permute.xlu1 %1200 }
 0x8d8   :  { %v3557_v57 = vpop.eup %3556 }
 0x8d9   :  { %v1052_v60 = vmul.f32 %v3557_v57, %v3549_v35 }
 0x8db   :  { %v1054_v63 = vpack.c.bf16 %v1052_v60, %v1051_v58 }
 0x8dd   :  { %3250 = vmatmul.mubr.msk.bf16.vlgmr.msra.gmra.mrb[32].mxu0 %vm508_vm4, %v1054_v63 }
 0x8de   :  { %3260 = vmatpush3.bf16.xpose.msra.mxu0 %v1208_v0  ;;  %3261 = vmatprep.mubr.msk.bf16.mxu0 %vm3624_vm0, %v3623_v20 }
 0x8df   :  { %3271 = vmatprep.subr.bf16.mxu0 %v3623_v20 }
 0x8e5   :  { %3262 = vmatmul.mubr.msk.bf16.vlgmr.msra.gmra.mrb[36].mxu0 %vm405_vm1, %v1201_v1 }
 0x8e6   :  { %3273 = vmatprep.mubr.msk.bf16.mxu0 %vm3624_vm0, %v3623_v20 }
 0x998   :  { %v4015_v6 = vpop.f32.mrb[20].mxu1 }
 0x999   :  { %v3245_v7 = vpop.f32.mrb[21].mxu1 }
 0x99a   :  { %v4017_v8 = vpop.f32.mrb[22].mxu1 }
 0x99b   :  { %v3314_v9 = vpack.i.bf16 %v4017_v8, %v4015_v6  ;;  %v3246_v10 = vpop.f32.mrb[23].mxu1 }
 0x9a5   :  { %v1193_v11 = vpop.f32.mrb[24].mxu1 }
 0x9a6   :  { %v1251_v12 = vmul.f32 0.17677669, %v1193_v11  ;;  %v3257_v14 = vpop.f32.mrb[25].mxu1 }
 0x9a7   :  { %v1196_v17 = vpop.f32.mrb[26].mxu1 }
 0x9a8   :  { %v1252_v18 = vmul.f32 0.17677669, %v1196_v17  ;;  %v3258_v19 = vpop.f32.mrb[27].mxu1  ;;  %v1255_v15 = vadd.f32 %v1251_v12, %v3871_v47 }
 0x9aa   :  { %v1259_v21 = vsel %vm508_vm4, %v1255_v15, -inf  ;;  %v1256_v20 = vadd.f32 %v1252_v18, %v3873_v51 }
 0x9ab   :  { %1260 = vmax.xlane.f32.xlu0 %v1259_v21  ;;  %v3366_v21 = vld [vmem:[%s4680_s4] sm:$0xff]  }
 0x9ac   :  { %v1262_v22 = vsel %vm508_vm4, %v1256_v20, -inf }
 0x9ad   :  { %1263 = vmax.xlane.f32.xlu1 %v1262_v22  ;;  %v3368_v22 = vld [vmem:[%s4680_s4 + $0x10] sm:$0xff]  }
 0x9b0   :  { %v1142_v24 = vpop.f32.mrb[32].mxu0 }
 0x9b1   :  { %v3251_v26 = vpop.f32.mrb[33].mxu0 }
 0x9b2   :  { %v1145_v28 = vpop.f32.mrb[34].mxu0  ;;  %v3370_v26 = vld [vmem:[%s4680_s4 + $0x20] sm:$0xff]  }
 0x9b3   :  { %v3319_v33 = vpack.i.bf16 %v1145_v28, %v1142_v24  ;;  %v3252_v34 = vpop.f32.mrb[35].mxu0  ;;  %v3369_v24 = vld [vmem:[%s4680_s4 + $0x18] sm:$0xff]   ;;  %v3371_v28 = vld [vmem:[%s4680_s4 + $0x28] sm:$0xff]  }
 0x9b8   :  { %v1244_v35 = vpop.f32.mrb[36].mxu0 }
 0x9b9   :  { %v1253_v37 = vmul.f32 0.17677669, %v1244_v35  ;;  %v3263_v25 = vpop.f32.mrb[37].mxu0 }
 0x9ba   :  { %v1247_v39 = vpop.f32.mrb[38].mxu0 }
 0x9bb   :  { %v1254_v40 = vmul.f32 0.17677669, %v1247_v39  ;;  %v3264_v43 = vpop.f32.mrb[39].mxu0  ;;  %v1257_v44 = vadd.f32 %v1253_v37, %v3871_v47 }
 0x9bd   :  { %v1265_v45 = vsel %vm508_vm4, %v1257_v44, -inf  ;;  %v1258_v46 = vadd.f32 %v1254_v40, %v3873_v51  ;;  %v3373_v40 = vld [vmem:[%s4680_s4 + $0x38] sm:$0xff]  }
 0x9be   :  { %1266 = vmax.xlane.f32.xlu0 %v1265_v45 }
 0x9bf   :  { %v1268_v48 = vsel %vm508_vm4, %v1258_v46, -inf }
 0x9c2   :  { %1269 = vmax.xlane.f32.xlu0 %v1268_v48 }
 0xa38   :  { %v1261_v23 = vpop.xlane.xlu0 %1260 }
 0xa39   :  { %v1271_v50 = vsub.f32 %v1255_v15, %v1261_v23 }
 0xa3a   :  { %v1264_v36 = vpop.xlane.xlu1 %1263 }
 0xa3b   :  { %v1275_v38 = vmul.f32 1.442695, %v1271_v50  ;;  %v1272_v54 = vsub.f32 %v1256_v20, %v1264_v36  ;;  %v3367_v20 = vld [vmem:[%s4680_s4 + $0x8] sm:$0xff]  }
 0xa3d   :  { %3558 = vpow2.f32 %v1275_v38  ;;  %v1277_v55 = vmul.f32 1.442695, %v1272_v54 }
 0xa3f   :  { %3560 = vpow2.f32 %v1277_v55 }
 0xa47   :  { %v3559_v56 = vpop.eup %3558 }
 0xa48   :  { %v1283_v57 = vsel %vm508_vm4, %v3559_v56, 0.0 }
 0xa49   :  { %v3561_v47 = vpop.eup %3560  ;;  %1284 = vadd.xlane.f32.xlu0 %v1283_v57 }
 0xa4a   :  { %v1286_v58 = vsel %vm508_vm4, %v3561_v47, 0.0 }
 0xa4b   :  { %1287 = vadd.xlane.f32.xlu1 %v1286_v58  ;;  %v1267_v51 = vpop.xlane.xlu0 %1266 }
 0xa4c   :  { %v1273_v60 = vsub.f32 %v1257_v44, %v1267_v51 }
 0xa4e   :  { %v1279_v62 = vmul.f32 1.442695, %v1273_v60 }
 0xa4f   :  { %v1270_v63 = vpop.xlane.xlu0 %1269 }
 0xa50   :  { %3562 = vpow2.f32 %v1279_v62  ;;  %v1274_v0 = vsub.f32 %v1258_v46, %v1270_v63 }
 0xa52   :  { %v1281_v1 = vmul.f32 1.442695, %v1274_v0 }
 0xa54   :  { %3564 = vpow2.f32 %v1281_v1 }
 0xa5a   :  { %v3563_v6 = vpop.eup %3562 }
 0xa5b   :  { %v1289_v7 = vsel %vm508_vm4, %v3563_v6, 0.0 }
 0xa5c   :  { %1290 = vadd.xlane.f32.xlu0 %v1289_v7 }
 0xa5e   :  { %v3565_v8 = vpop.eup %3564 }
 0xa5f   :  { %v1292_v10 = vsel %vm508_vm4, %v3565_v8, 0.0 }
 0xa60   :  { %1293 = vadd.xlane.f32.xlu1 %v1292_v10 }
 0xa71   :  { %1352 = vrot.lane.b32.xlu1 %v3843_v30, %s3628_s24 }
 0xa72   :  { %1305 = vrot.lane.b32.xlu0 %v3845_v32, %s3628_s24 }
 0xa75   :  { %3305 = vrot.lane.b32.xlu1 %v3304_v31, %s3628_s24 }
 0xa76   :  { %3315 = vrot.lane.b32.xlu0 %v3314_v9, %s3627_s2 }
 0xa79   :  { %3310 = vrot.lane.b32.xlu1 %v3309_v53, %s3628_s24 }
 0xa7d   :  { %3320 = vrot.lane.b32.xlu1 %v3319_v33, %s3627_s2  ;;  %v3372_v33 = vld [vmem:[%s4680_s4 + $0x30] sm:$0xff]  }
 0xad6   :  { %v1285_v12 = vpop.xlane.xlu0 %1284 }
 0xad8   :  { %v1288_v11 = vpop.xlane.xlu1 %1287 }
 0xad9   :  { %3566 = vrcp.f32 %v1288_v11 }
 0xada   :  { %3568 = vrcp.f32 %v1285_v12 }
 0xae3   :  { %v3567_v30 = vpop.eup %3566 }
 0xae4   :  { %v3569_v14 = vpop.eup %3568  ;;  %v1300_v17 = vmul.f32 %v3567_v30, %v3561_v47 }
 0xae5   :  { %v1299_v27 = vmul.f32 %v3569_v14, %v3559_v56 }
 0xae7   :  { %v1303_v9 = vpack.c.bf16 %v1300_v17, %v1299_v27 }
 0xae9   :  { %v1291_v32 = vpop.xlane.xlu0 %1290 }
 0xaea   :  { %3570 = vrcp.f32 %v1291_v32 }
 0xaed   :  { %v1294_v29 = vpop.xlane.xlu1 %1293  ;;  %v1306_v31 = vpop.permute.xlu0 %1305 }
 0xaee   :  { %3572 = vrcp.f32 %v1294_v29  ;;  %3266 = vmatpush3.bf16.msra.mxu1 %v1306_v31 }
 0xaef   :  { %3277 = vmatprep.subr.bf16.mxu1 %v3366_v21 }
 0xaf1   :  { %v1353_v18 = vpop.permute.xlu1 %1352  ;;  %3268 = vmatmul.mubr.msk.bf16.vlgmr.msra.gmra.mrb[28].mxu1 %vm508_vm4, %v1303_v9  ;;  %v3316_v38 = vpop.permute.xlu0 %3315 }
 0xaf2   :  { %3272 = vmatpush3.bf16.msra.mxu0 %v1353_v18  ;;  %3278 = vmatpush3.bf16.msra.mxu1 %v3366_v21  ;;  %v3318_v56 = vunpack.i.h.bf16 %v3316_v38  ;;  %v3317_v57 = vunpack.i.l.bf16 %v3316_v38  ;;  %v3379_v21 = vld [vmem:[%s4681_s7 + $0xc] ss:$16 sps:$4 sm:$0xff]  }
 0xaf3   :  { %3279 = vmatprep.subr.bf16.mxu1 %v3367_v20  ;;  %v3391_v38 = vld [vmem:[%s4681_s7 + $0x4c] ss:$16 sps:$4 sm:$0xff]  }
 0xaf4   :  { %v3571_v49 = vpop.eup %3570 }
 0xaf5   :  { %v1301_v53 = vmul.f32 %v3571_v49, %v3563_v6  ;;  %v3306_v23 = vpop.permute.xlu1 %3305 }
 0xaf6   :  { %3280 = vmatpush3.bf16.msra.mxu1 %v3367_v20  ;;  %v3308_v50 = vunpack.i.h.bf16 %v3306_v23  ;;  %v3307_v36 = vunpack.i.l.bf16 %v3306_v23  ;;  %v3382_v20 = vld [vmem:[%s4681_s7 + $0x24] ss:$16 sps:$4 sm:$0xff]  }
 0xaf7   :  { %3281 = vmatprep.subr.bf16.mxu1 %v3368_v22 }
 0xaf8   :  { %v3573_v52 = vpop.eup %3572  ;;  %v1448_v54 = vsel %vm405_vm1, %v3913_v61, %v3308_v50  ;;  %v1447_v55 = vsel %vm405_vm1, %v3911_v59, %v3307_v36  ;;  %v3388_v36 = vld [vmem:[%s4681_s7 + $0x44] ss:$16 sps:$4 sm:$0xff]  }
 0xaf9   :  { %v1302_v19 = vmul.f32 %v3573_v52, %v3565_v8  ;;  %v3311_v58 = vpop.permute.xlu1 %3310  ;;  %v1452_v62 = vsel %vm1451_vm5, %v1447_v55, %v3317_v57  ;;  %v1453_v63 = vsel %vm1451_vm5, %v1448_v54, %v3318_v56  ;;  %v3386_v54 = vld [vmem:[%s4681_s7 + $0x40] ss:$16 sps:$4 sm:$0xff]   ;;  %v3389_v55 = vld [vmem:[%s4681_s7 + $0x48] ss:$16 sps:$4 sm:$0xff]   ;;  %v3394_v56 = vld [vmem:[%s4681_s7 + $0x64] ss:$16 sps:$4 sm:$0xff]  }
 0xafa   :  { %3282 = vmatpush3.bf16.msra.mxu1 %v3368_v22  ;;  %v3313_v59 = vunpack.i.h.bf16 %v3311_v58  ;;  %v3312_v7 = vunpack.i.l.bf16 %v3311_v58  ;;  %v3383_v22 = vld [vmem:[%s4681_s7 + $0x28] ss:$16 sps:$4 sm:$0xff]   ;;  %v3397_v57 = vld [vmem:[%s4681_s7 + $0x6c] ss:$16 sps:$4 sm:$0xff]  }
 0xafb   :  { %v1304_v15 = vpack.c.bf16 %v1302_v19, %v1301_v53  ;;  %3283 = vmatprep.subr.bf16.mxu1 %v3369_v24  ;;  %v3395_v58 = vld [vmem:[%s4681_s7 + $0x68] ss:$16 sps:$4 sm:$0xff]  }
 0xafc   :  { %v1450_v12 = vsel %vm405_vm1, %v3921_v16, %v3313_v59  ;;  %v1449_v30 = vsel %vm405_vm1, %v3919_v13, %v3312_v7  ;;  %v3412_v59 = vld [vmem:[%s4681_s7 + $0xc4] ss:$16 sps:$4 sm:$0xff]   ;;  %v3415_v7 = vld [vmem:[%s4681_s7 + $0xcc] ss:$16 sps:$4 sm:$0xff]  }
 0xafd   :  { %3274 = vmatmul.mubr.msk.bf16.vlgmr.msra.gmra.mrb[40].mxu0 %vm508_vm4, %v1304_v15  ;;  %v3321_v6 = vpop.permute.xlu1 %3320 }
 0xafe   :  { %1894 = vmatprep.mubr.bf16.mxu0 %v3622_v41  ;;  %3284 = vmatpush3.bf16.msra.mxu1 %v3369_v24  ;;  %v3323_v8 = vunpack.i.h.bf16 %v3321_v6  ;;  %v3322_v10 = vunpack.i.l.bf16 %v3321_v6  ;;  %v3385_v24 = vld [vmem:[%s4681_s7 + $0x2c] ss:$16 sps:$4 sm:$0xff]   ;;  %v3407_v6 = vld [vmem:[%s4681_s7 + $0xa8] ss:$16 sps:$4 sm:$0xff]  }
 0xaff   :  { %3285 = vmatprep.subr.bf16.mxu1 %v3370_v26 }
 0xb00   :  { %v1454_v17 = vsel %vm1451_vm5, %v1449_v30, %v3322_v10  ;;  %v1455_v27 = vsel %vm1451_vm5, %v1450_v12, %v3323_v8  ;;  %v3410_v8 = vld [vmem:[%s4681_s7 + $0xc0] ss:$16 sps:$4 sm:$0xff]   ;;  %v3413_v10 = vld [vmem:[%s4681_s7 + $0xc8] ss:$16 sps:$4 sm:$0xff]   ;;  %v3421_v12 = vld [vmem:[%s4681_s7 + $0xec] ss:$16 sps:$4 sm:$0xff]  }
 0xb01   :  { %v3416_v30 = vld [vmem:[%s4681_s7 + $0xe0] ss:$16 sps:$4 sm:$0xff]  }
 0xb02   :  { %3286 = vmatpush3.bf16.msra.mxu1 %v3370_v26 }
 0xb03   :  { %3287 = vmatprep.subr.bf16.mxu1 %v3371_v28 }
 0xb06   :  { %3288 = vmatpush3.bf16.msra.mxu1 %v3371_v28 }
 0xb07   :  { %3289 = vmatprep.subr.bf16.mxu1 %v3372_v33 }
 0xb0a   :  { %3290 = vmatpush3.bf16.msra.mxu1 %v3372_v33 }
 0xb0b   :  { %3291 = vmatprep.subr.bf16.mxu1 %v3373_v40 }
 0xb0e   :  { %3292 = vmatpush3.bf16.msra.mxu1 %v3373_v40 }
 0xb0f   :  { %1915 = vmatprep.subr.bf16.mxu1 %v3379_v21  ;;  %v2943_v21 = vld [vmem:[%s4682_s5] ss:$0 sm:$0xff] }
 0xbc4   :  { %v1345_v34 = vpop.f32.mrb[28].mxu1 }
 0xbc5   :  { %v3269_v35 = vpop.f32.mrb[29].mxu1 }
 0xbc6   :  { %v1348_v37 = vpop.f32.mrb[30].mxu1 }
 0xbc7   :  { %v3324_v25 = vpack.i.bf16 %v1348_v37, %v1345_v34  ;;  %v3270_v39 = vpop.f32.mrb[31].mxu1 }
 0xbc9   :  { %3325 = vrot.lane.b32.xlu0 %v3324_v25, %s3626_s1 }
 0xbd0   :  { %v1392_v43 = vpop.f32.mrb[40].mxu0 }
 0xbd1   :  { %v3275_v44 = vpop.f32.mrb[41].mxu0 }
 0xbd2   :  { %v1395_v45 = vpop.f32.mrb[42].mxu0 }
 0xbd3   :  { %v3329_v46 = vpack.i.bf16 %v1395_v45, %v1392_v43  ;;  %v3276_v48 = vpop.f32.mrb[43].mxu0 }
 0xbd5   :  { %3330 = vrot.lane.b32.xlu1 %v3329_v46, %s3626_s1 }
 0xc3b   :  { %v3326_v47 = vpop.permute.xlu0 %3325 }
 0xc3c   :  { %v3328_v51 = vunpack.i.h.bf16 %v3326_v47  ;;  %v3327_v60 = vunpack.i.l.bf16 %v3326_v47  ;;  %v3392_v47 = vld [vmem:[%s4681_s7 + $0x60] ss:$16 sps:$4 sm:$0xff]  }
 0xc3e   :  { %v1457_v0 = vsel %vm1456_vm6, %v1452_v62, %v3327_v60  ;;  %v1458_v1 = vsel %vm1456_vm6, %v1453_v63, %v3328_v51  ;;  %v3400_v51 = vld [vmem:[%s4681_s7 + $0x84] ss:$16 sps:$4 sm:$0xff]   ;;  %v3403_v60 = vld [vmem:[%s4681_s7 + $0x8c] ss:$16 sps:$4 sm:$0xff]   ;;  %v3398_v62 = vld [vmem:[%s4681_s7 + $0x80] ss:$16 sps:$4 sm:$0xff]  }
 0xc3f   :  { %v1461_v61 = vpack.c.bf16 %v1458_v1, %v1457_v0  ;;  %v3401_v63 = vld [vmem:[%s4681_s7 + $0x88] ss:$16 sps:$4 sm:$0xff]   ;;  %v3406_v0 = vld [vmem:[%s4681_s7 + $0xa4] ss:$16 sps:$4 sm:$0xff]   ;;  %v3409_v1 = vld [vmem:[%s4681_s7 + $0xac] ss:$16 sps:$4 sm:$0xff]  }
 0xc41   :  { %3293 = vmatprep.mubr.bf16.mxu1 %v1461_v61  ;;  %v3404_v61 = vld [vmem:[%s4681_s7 + $0xa0] ss:$16 sps:$4 sm:$0xff]  }
 0xc47   :  { %v3331_v11 = vpop.permute.xlu1 %3330 }
 0xc48   :  { %v3333_v32 = vunpack.i.h.bf16 %v3331_v11  ;;  %v3332_v14 = vunpack.i.l.bf16 %v3331_v11  ;;  %v3418_v11 = vld [vmem:[%s4681_s7 + $0xe4] ss:$16 sps:$4 sm:$0xff]  }
 0xc4a   :  { %v1460_v29 = vsel %vm1456_vm6, %v1455_v27, %v3333_v32  ;;  %v1459_v31 = vsel %vm1456_vm6, %v1454_v17, %v3332_v14  ;;  %v3419_v32 = vld [vmem:[%s4681_s7 + $0xe8] ss:$16 sps:$4 sm:$0xff]  }
 0xc4b   :  { %v1462_v9 = vpack.c.bf16 %v1460_v29, %v1459_v31 }
 0xc4d   :  { %3294 = vmatmul.mubr.bf16.vlgmr.msra.gmra.mrb[32].mxu1 %v1462_v9 }
 0xc4e   :  { %1947 = vmatprep.mubr.bf16.mxu1 %v3622_v41 }
 0xd20   :  { %v3295_v18 = vpop.f32.mrb[32].mxu1 }
 0xd21   :  { %v1561_v49 = vpop.f32.mrb[33].mxu1  ;;  %v4101_v19 = vadd.f32 %v3295_v18, %v3717_v3  ;;  %v3377_v3 = vld [vmem:[%s4681_s7 + $0x8] ss:$16 sps:$4 sm:$0xff]  }
 0xd22   :  { %v4094_v16 = vadd.f32 %v3715_v2, %v1561_v49  ;;  %v3296_v13 = vpop.f32.mrb[34].mxu1  ;;  %v3374_v2 = vld [vmem:[%s4681_s7] ss:$16 sps:$4 sm:$0xff]   ;;  %1916 = vmatpush1.bf16.msra.mxu1 %v3377_v3 }
 0xd23   :  { %v1564_v52 = vpop.f32.mrb[35].mxu1  ;;  %v4106_v15 = vadd.f32 %v3296_v13, %v3723_v5  ;;  %v3380_v5 = vld [vmem:[%s4681_s7 + $0x20] ss:$16 sps:$4 sm:$0xff]   ;;  %1917 = vmatprep.subr.bf16.mxu1 %v3385_v24 }
 0xd24   :  { %v4097_v53 = vadd.f32 %v3721_v4, %v1564_v52  ;;  %1582 = vadd.xlane.f32.xlu0 %v4094_v16  ;;  %v3376_v4 = vld [vmem:[%s4681_s7 + $0x4] ss:$16 sps:$4 sm:$0xff]  }
 0xd25   :  { %1862 = vmatprep.subr.bf16.mxu0 %v3376_v4 }
 0xd26   :  { %1584 = vadd.xlane.f32.xlu1 %v4097_v53  ;;  %1863 = vmatpush1.bf16.msra.mxu0 %v3374_v2 }
 0xd27   :  { %1864 = vmatprep.subr.bf16.mxu0 %v3382_v20  ;;  %1918 = vmatpush1.bf16.msra.mxu1 %v3383_v22 }
 0xd28   :  { %1586 = vadd.xlane.f32.xlu0 %v4101_v19  ;;  %1919 = vmatprep.subr.bf16.mxu1 %v3391_v38  ;;  %v3425_v38 = vld [vmem:[%s4684_s9 + $0x80] sm:$0xff]  }
 0xd2a   :  { %1865 = vmatpush1.bf16.msra.mxu0 %v3380_v5 }
 0xd2b   :  { %1866 = vmatprep.subr.bf16.mxu0 %v3388_v36  ;;  %1920 = vmatpush1.bf16.msra.mxu1 %v3389_v55  ;;  %v3424_v36 = vld [vmem:[%s4684_s9] sm:$0xff]   ;;  %v3427_v55 = vld [vmem:[%s4684_s9 + $0xc8] sm:$0xff]  }
 0xd2c   :  { %1588 = vadd.xlane.f32.xlu0 %v4106_v15  ;;  %1921 = vmatprep.subr.bf16.mxu1 %v3397_v57  ;;  %v3429_v57 = vld [vmem:[%s4684_s9 + $0x88] sm:$0xff]  }
 0xd2e   :  { %1867 = vmatpush1.bf16.msra.mxu0 %v3386_v54  ;;  %v3426_v54 = vld [vmem:[%s4684_s9 + $0x48] sm:$0xff]  }
 0xd2f   :  { %1868 = vmatprep.subr.bf16.mxu0 %v3394_v56  ;;  %1922 = vmatpush1.bf16.msra.mxu1 %v3395_v58  ;;  %v3428_v56 = vld [vmem:[%s4684_s9 + $0x8] sm:$0xff]   ;;  %v3431_v58 = vld [vmem:[%s4684_s9 + $0xd0] sm:$0xff]  }
 0xd30   :  { %1923 = vmatprep.subr.bf16.mxu1 %v3403_v60  ;;  %v3433_v60 = vld [vmem:[%s4684_s9 + $0x90] sm:$0xff]  }
 0xd32   :  { %1869 = vmatpush1.bf16.msra.mxu0 %v3392_v47  ;;  %v3430_v47 = vld [vmem:[%s4684_s9 + $0x50] sm:$0xff]  }
 0xd33   :  { %1870 = vmatprep.subr.bf16.mxu0 %v3400_v51  ;;  %1924 = vmatpush1.bf16.msra.mxu1 %v3401_v63  ;;  %v3432_v51 = vld [vmem:[%s4684_s9 + $0x10] sm:$0xff]   ;;  %v3435_v63 = vld [vmem:[%s4684_s9 + $0xd8] sm:$0xff]  }
 0xd34   :  { %1925 = vmatprep.subr.bf16.mxu1 %v3409_v1  ;;  %v3437_v1 = vld [vmem:[%s4684_s9 + $0x98] sm:$0xff]  }
 0xd36   :  { %1871 = vmatpush1.bf16.msra.mxu0 %v3398_v62  ;;  %v3434_v62 = vld [vmem:[%s4684_s9 + $0x58] sm:$0xff]  }
 0xd37   :  { %1872 = vmatprep.subr.bf16.mxu0 %v3406_v0  ;;  %1926 = vmatpush1.bf16.msra.mxu1 %v3407_v6  ;;  %v3436_v0 = vld [vmem:[%s4684_s9 + $0x18] sm:$0xff]   ;;  %v3439_v6 = vld [vmem:[%s4684_s9 + $0xe0] sm:$0xff]  }
 0xd38   :  { %1927 = vmatprep.subr.bf16.mxu1 %v3415_v7  ;;  %v3441_v7 = vld [vmem:[%s4684_s9 + $0xa0] sm:$0xff]  }
 0xd3a   :  { %1873 = vmatpush1.bf16.msra.mxu0 %v3404_v61  ;;  %v3438_v61 = vld [vmem:[%s4684_s9 + $0x60] sm:$0xff]  }
 0xd3b   :  { %1874 = vmatprep.subr.bf16.mxu0 %v3412_v59  ;;  %1928 = vmatpush1.bf16.msra.mxu1 %v3413_v10  ;;  %v3440_v59 = vld [vmem:[%s4684_s9 + $0x20] sm:$0xff]   ;;  %v3443_v10 = vld [vmem:[%s4684_s9 + $0xe8] sm:$0xff]  }
 0xd3c   :  { %1929 = vmatprep.subr.bf16.mxu1 %v3421_v12  ;;  %v3445_v12 = vld [vmem:[%s4684_s9 + $0xa8] sm:$0xff]  }
 0xd3e   :  { %1875 = vmatpush1.bf16.msra.mxu0 %v3410_v8  ;;  %v3442_v8 = vld [vmem:[%s4684_s9 + $0x68] sm:$0xff]  }
 0xd3f   :  { %1876 = vmatprep.subr.bf16.mxu0 %v3418_v11  ;;  %1930 = vmatpush1.bf16.msra.mxu1 %v3419_v32  ;;  %v3444_v11 = vld [vmem:[%s4684_s9 + $0x28] sm:$0xff]   ;;  %v3447_v32 = vld [vmem:[%s4684_s9 + $0xf0] sm:$0xff]  }
 0xd42   :  { %1877 = vmatpush1.bf16.msra.mxu0 %v3416_v30  ;;  %v3446_v30 = vld [vmem:[%s4684_s9 + $0x70] sm:$0xff]  }
 0xdb1   :  { %v1583_v26 = vpop.xlane.xlu0 %1582 }
 0xdb2   :  { %v1590_v28 = vmul.f32 0.0078125, %v1583_v26 }
 0xdb3   :  { %v1585_v33 = vpop.xlane.xlu1 %1584 }
 0xdb4   :  { %v4134_v34 = vsub.f32 %v4094_v16, %v1590_v28  ;;  %v1591_v35 = vmul.f32 0.0078125, %v1585_v33  ;;  %v2944_v28 = vld [vmem:[%s4683_s6] ss:$0 sm:$0xff] }
 0xdb5   :  { %v1587_v37 = vpop.xlane.xlu0 %1586 }
 0xdb6   :  { %v4137_v25 = vsub.f32 %v4097_v53, %v1591_v35  ;;  %v1592_v39 = vmul.f32 0.0078125, %v1587_v37  ;;  %v1598_v40 = vmul.f32 %v4134_v34, %v4134_v34 }
 0xdb8   :  { %v4142_v43 = vsub.f32 %v4101_v19, %v1592_v39  ;;  %1602 = vadd.xlane.f32.xlu0 %v1598_v40  ;;  %v1599_v44 = vmul.f32 %v4137_v25, %v4137_v25 }
 0xdb9   :  { %v1589_v45 = vpop.xlane.xlu0 %1588 }
 0xdba   :  { %v1593_v46 = vmul.f32 0.0078125, %v1589_v45  ;;  %1604 = vadd.xlane.f32.xlu1 %v1599_v44  ;;  %v1600_v48 = vmul.f32 %v4142_v43, %v4142_v43 }
 0xdbc   :  { %v4149_v23 = vsub.f32 %v4106_v15, %v1593_v46  ;;  %1606 = vadd.xlane.f32.xlu0 %v1600_v48 }
 0xdbe   :  { %v1601_v50 = vmul.f32 %v4149_v23, %v4149_v23 }
 0xdc0   :  { %1608 = vadd.xlane.f32.xlu1 %v1601_v50 }
 0xe45   :  { %v1603_v14 = vpop.xlane.xlu0 %1602 }
 0xe46   :  { %v1610_v17 = vmul.f32 0.0078125, %v1603_v14  ;;  %v3448_v14 = vld [vmem:[%s4684_s9 + $0x30] sm:$0xff]  }
 0xe47   :  { %v1605_v27 = vpop.xlane.xlu1 %1604 }
 0xe48   :  { %v1614_v29 = vadd.f32 1e-05, %v1610_v17  ;;  %v1611_v31 = vmul.f32 0.0078125, %v1605_v27  ;;  %v3449_v17 = vld [vmem:[%s4684_s9 + $0xb0] sm:$0xff]   ;;  %v3450_v27 = vld [vmem:[%s4684_s9 + $0x78] sm:$0xff]  }
 0xe49   :  { %v1607_v9 = vpop.xlane.xlu0 %1606 }
 0xe4a   :  { %3574 = vrsqrt.f32 %v1614_v29  ;;  %v1615_v18 = vadd.f32 1e-05, %v1611_v31  ;;  %v1612_v49 = vmul.f32 0.0078125, %v1607_v9  ;;  %v3451_v29 = vld [vmem:[%s4684_s9 + $0xf8] sm:$0xff]  }
 0xe4b   :  { %v3452_v31 = vld [vmem:[%s4684_s9 + $0x38] sm:$0xff]  }
 0xe4c   :  { %3576 = vrsqrt.f32 %v1615_v18  ;;  %v1616_v13 = vadd.f32 1e-05, %v1612_v49  ;;  %v3453_v9 = vld [vmem:[%s4684_s9 + $0xb8] sm:$0xff]   ;;  %v1684_v18 = vsub.s32 0, %v3867_v42  ;;  %v1692_v49 = vsub.s32 2, %v3867_v42 }
 0xe4d   :  { %v1609_v52 = vpop.xlane.xlu1 %1608 }
 0xe4e   :  { %3578 = vrsqrt.f32 %v1616_v13  ;;  %v1613_v2 = vmul.f32 0.0078125, %v1609_v52  ;;  %v1680_v13 = vld [vmem:[%s4685_s8] sm:$0xf]  ;;  %v1688_v52 = vsub.s32 1, %v3867_v42 }
 0xe50   :  { %v1617_v4 = vadd.f32 1e-05, %v1613_v2  ;;  %v1696_v2 = vsub.s32 3, %v3867_v42 }
 0xe52   :  { %3580 = vrsqrt.f32 %v1617_v4  ;;  %v4342_v4 = vrot.slane %v1680_v13, %v1684_v18 }
 0xe54   :  { %v3575_v3 = vpop.eup %3574 }
 0xe55   :  { %v1622_v5 = vmul.f32 %v3575_v3, %v4134_v34  ;;  %v4346_v3 = vrot.slane %v1680_v13, %v1692_v49 }
 0xe56   :  { %v3577_v20 = vpop.eup %3576 }
 0xe57   :  { %v1623_v22 = vmul.f32 %v3577_v20, %v4137_v25  ;;  %v1632_v24 = vmul.f32 %v2943_v21, %v1622_v5  ;;  %v4354_v5 = vrot.slane %v1680_v13, %v1696_v2 }
 0xe58   :  { %v3579_v26 = vpop.eup %3578 }
 0xe59   :  { %v1633_v33 = vmul.f32 %v2943_v21, %v1623_v22  ;;  %v1642_v35 = vadd.f32 %v2944_v28, %v1632_v24  ;;  %v1624_v39 = vmul.f32 %v3579_v26, %v4142_v43  ;;  %v3422_v43 = vld [vmem:[%s4684_s9 + $0x40] sm:$0xff]  }
 0xe5a   :  { %3105 = vmatprep.subr.bf16.mxu0 %v3422_v43 }
 0xe5b   :  { %v1643_v37 = vadd.f32 %v2944_v28, %v1633_v33  ;;  %v1634_v34 = vmul.f32 %v2943_v21, %v1624_v39 }
 0xe5c   :  { %v3581_v40 = vpop.eup %3580 }
 0xe5d   :  { %v1646_v44 = vpack.c.bf16 %v1643_v37, %v1642_v35  ;;  %v1625_v45 = vmul.f32 %v3581_v40, %v4149_v23  ;;  %v1644_v48 = vadd.f32 %v2944_v28, %v1634_v34  ;;  %v3423_v23 = vld [vmem:[%s4684_s9 + $0xc0] sm:$0xff]  }
 0xe5e   :  { %3133 = vmatprep.subr.bf16.mxu1 %v3423_v23 }
 0xe5f   :  { %1895 = vmatmul.mubr.bf16.vlgmr.msra.gmra.mrb[44].mxu0 %v1646_v44  ;;  %1948 = vmatmul.mubr.bf16.vlgmr.msra.gmra.mrb[36].mxu1 %v1646_v44  ;;  %v1635_v46 = vmul.f32 %v2943_v21, %v1625_v45  ;;  %v4350_v21 = vrot.slane %v1680_v13, %v1688_v52 }
 0xe60   :  { %1904 = vmatprep.mubr.bf16.mxu0 %v3622_v41  ;;  %1957 = vmatprep.mubr.bf16.mxu1 %v3622_v41 }
 0xe61   :  { %v1645_v25 = vadd.f32 %v2944_v28, %v1635_v46  ;;  %3106 = vmatpush3.bf16.msra.mxu0 %v3424_v36  ;;  %3134 = vmatpush3.bf16.msra.mxu1 %v3425_v38 }
 0xe62   :  { %3107 = vmatprep.subr.bf16.mxu0 %v3426_v54  ;;  %3135 = vmatprep.subr.bf16.mxu1 %v3427_v55 }
 0xe63   :  { %v1647_v50 = vpack.c.bf16 %v1645_v25, %v1644_v48 }
 0xe65   :  { %3108 = vmatpush3.bf16.msra.mxu0 %v3428_v56  ;;  %3136 = vmatpush3.bf16.msra.mxu1 %v3429_v57 }
 0xe66   :  { %3109 = vmatprep.subr.bf16.mxu0 %v3430_v47  ;;  %3137 = vmatprep.subr.bf16.mxu1 %v3431_v58 }
 0xe67   :  { %1905 = vmatmul.mubr.bf16.gmra.mrb[48].mxu0 %v1647_v50  ;;  %1958 = vmatmul.mubr.bf16.gmra.mrb[40].mxu1 %v1647_v50 }
 0xe69   :  { %3110 = vmatpush3.bf16.msra.mxu0 %v3432_v51  ;;  %3138 = vmatpush3.bf16.msra.mxu1 %v3433_v60 }
 0xe6a   :  { %3111 = vmatprep.subr.bf16.mxu0 %v3434_v62  ;;  %3139 = vmatprep.subr.bf16.mxu1 %v3435_v63 }
 0xe6d   :  { %3112 = vmatpush3.bf16.msra.mxu0 %v3436_v0  ;;  %3140 = vmatpush3.bf16.msra.mxu1 %v3437_v1 }
 0xe6e   :  { %3113 = vmatprep.subr.bf16.mxu0 %v3438_v61  ;;  %3141 = vmatprep.subr.bf16.mxu1 %v3439_v6 }
 0xe71   :  { %3114 = vmatpush3.bf16.msra.mxu0 %v3440_v59  ;;  %3142 = vmatpush3.bf16.msra.mxu1 %v3441_v7 }
 0xe72   :  { %3115 = vmatprep.subr.bf16.mxu0 %v3442_v8  ;;  %3143 = vmatprep.subr.bf16.mxu1 %v3443_v10 }
 0xe75   :  { %3116 = vmatpush3.bf16.msra.mxu0 %v3444_v11  ;;  %3144 = vmatpush3.bf16.msra.mxu1 %v3445_v12 }
 0xe76   :  { %3117 = vmatprep.subr.bf16.mxu0 %v3446_v30  ;;  %3145 = vmatprep.subr.bf16.mxu1 %v3447_v32 }
 0xe79   :  { %3118 = vmatpush3.bf16.msra.mxu0 %v3448_v14  ;;  %3146 = vmatpush3.bf16.msra.mxu1 %v3449_v17 }
 0xe7a   :  { %3119 = vmatprep.subr.bf16.mxu0 %v3450_v27  ;;  %3147 = vmatprep.subr.bf16.mxu1 %v3451_v29 }
 0xe7d   :  { %3120 = vmatpush3.bf16.msra.mxu0 %v3452_v31  ;;  %3148 = vmatpush3.bf16.msra.mxu1 %v3453_v9 }
 0xf32   :  { %v1896_v20 = vpop.f32.mrb[44].mxu0  ;;  %v1949_v22 = vpop.f32.mrb[36].mxu1 }
 0xf33   :  { %v4357_v24 = vadd.f32 %v1896_v20, %v4342_v4  ;;  %v4360_v26 = vadd.f32 %v1949_v22, %v4346_v3  ;;  %v1898_v28 = vpop.f32.mrb[45].mxu0  ;;  %v1951_v33 = vpop.f32.mrb[37].mxu1 }
 0xf34   :  { %v4363_v35 = vadd.f32 %v1898_v28, %v4350_v21  ;;  %v4366_v37 = vadd.f32 %v1951_v33, %v4354_v5  ;;  %v1900_v39 = vpop.f32.mrb[46].mxu0  ;;  %v1953_v40 = vpop.f32.mrb[38].mxu1 }
 0xf35   :  { %v1968_v44 = vmul.f32 %v4357_v24, %v4357_v24  ;;  %v1970_v45 = vmul.f32 %v4360_v26, %v4360_v26  ;;  %v4373_v34 = vadd.f32 %v1900_v39, %v4342_v4  ;;  %v4376_v46 = vadd.f32 %v1953_v40, %v4346_v3  ;;  %v1902_v25 = vpop.f32.mrb[47].mxu0  ;;  %v1955_v48 = vpop.f32.mrb[39].mxu1 }
 0xf36   :  { %v1969_v50 = vmul.f32 %v4363_v35, %v4363_v35  ;;  %v1971_v43 = vmul.f32 %v4366_v37, %v4366_v37  ;;  %v4383_v23 = vadd.f32 %v1902_v25, %v4350_v21  ;;  %v4386_v36 = vadd.f32 %v1955_v48, %v4354_v5 }
 0xf37   :  { %v1984_v38 = vmul.f32 %v1968_v44, %v4357_v24  ;;  %v1986_v54 = vmul.f32 %v1970_v45, %v4360_v26  ;;  %v1972_v55 = vmul.f32 %v4373_v34, %v4373_v34  ;;  %v1974_v56 = vmul.f32 %v4376_v46, %v4376_v46 }
 0xf38   :  { %v1985_v57 = vmul.f32 %v1969_v50, %v4363_v35  ;;  %v1987_v47 = vmul.f32 %v1971_v43, %v4366_v37  ;;  %v1973_v58 = vmul.f32 %v4383_v23, %v4383_v23  ;;  %v1975_v51 = vmul.f32 %v4386_v36, %v4386_v36 }
 0xf39   :  { %v2000_v60 = vmul.f32 0.044715, %v1984_v38  ;;  %v2002_v62 = vmul.f32 0.044715, %v1986_v54  ;;  %v1988_v63 = vmul.f32 %v1972_v55, %v4373_v34  ;;  %v1990_v0 = vmul.f32 %v1974_v56, %v4376_v46 }
 0xf3a   :  { %v2001_v1 = vmul.f32 0.044715, %v1985_v57  ;;  %v2003_v61 = vmul.f32 0.044715, %v1987_v47  ;;  %v1989_v6 = vmul.f32 %v1973_v58, %v4383_v23  ;;  %v1991_v59 = vmul.f32 %v1975_v51, %v4386_v36  ;;  %v1906_v7 = vpop.f32.mrb[48].mxu0  ;;  %v1959_v8 = vpop.f32.mrb[40].mxu1 }
 0xf3b   :  { %v2016_v10 = vadd.f32 %v2000_v60, %v4357_v24  ;;  %v2018_v11 = vadd.f32 %v2002_v62, %v4360_v26  ;;  %v2004_v12 = vmul.f32 0.044715, %v1988_v63  ;;  %v2006_v30 = vmul.f32 0.044715, %v1990_v0  ;;  %v1908_v32 = vpop.f32.mrb[49].mxu0  ;;  %v1961_v14 = vpop.f32.mrb[41].mxu1 }
 0xf3c   :  { %v2017_v17 = vadd.f32 %v2001_v1, %v4363_v35  ;;  %v2019_v27 = vadd.f32 %v2003_v61, %v4366_v37  ;;  %v2005_v29 = vmul.f32 0.044715, %v1989_v6  ;;  %v2007_v31 = vmul.f32 0.044715, %v1991_v59  ;;  %v1910_v9 = vpop.f32.mrb[50].mxu0  ;;  %v1963_v13 = vpop.f32.mrb[42].mxu1 }
 0xf3d   :  { %v2032_v20 = vmul.f32 0.7978846, %v2016_v10  ;;  %v2034_v22 = vmul.f32 0.7978846, %v2018_v11  ;;  %v2020_v28 = vadd.f32 %v2004_v12, %v4373_v34  ;;  %v2022_v33 = vadd.f32 %v2006_v30, %v4376_v46  ;;  %v1912_v39 = vpop.f32.mrb[51].mxu0  ;;  %v1965_v40 = vpop.f32.mrb[43].mxu1 }
 0xf3e   :  { %v2033_v44 = vmul.f32 0.7978846, %v2017_v17  ;;  %v2035_v45 = vmul.f32 0.7978846, %v2019_v27  ;;  %v2021_v25 = vadd.f32 %v2005_v29, %v4383_v23  ;;  %v2023_v48 = vadd.f32 %v2007_v31, %v4386_v36 }
 0xf3f   :  { %3582 = vtanh.f32 %v2032_v20  ;;  %v2036_v50 = vmul.f32 0.7978846, %v2020_v28  ;;  %v2038_v43 = vmul.f32 0.7978846, %v2022_v33  ;;  %v4413_v38 = vadd.f32 %v1906_v7, %v4342_v4 }
 0xf40   :  { %3584 = vtanh.f32 %v2034_v22  ;;  %v2037_v54 = vmul.f32 0.7978846, %v2021_v25  ;;  %v2039_v55 = vmul.f32 0.7978846, %v2023_v48  ;;  %v4416_v56 = vadd.f32 %v1959_v8, %v4346_v3 }
 0xf41   :  { %3586 = vtanh.f32 %v2033_v44  ;;  %v1976_v57 = vmul.f32 %v4413_v38, %v4413_v38  ;;  %v4421_v47 = vadd.f32 %v1908_v32, %v4350_v21  ;;  %v4424_v58 = vadd.f32 %v1961_v14, %v4354_v5 }
 0xf42   :  { %3588 = vtanh.f32 %v2035_v45  ;;  %v1978_v51 = vmul.f32 %v4416_v56, %v4416_v56  ;;  %v4429_v60 = vadd.f32 %v1910_v9, %v4342_v4  ;;  %v4432_v62 = vadd.f32 %v1963_v13, %v4346_v3 }
 0xf43   :  { %3590 = vtanh.f32 %v2036_v50  ;;  %v1992_v63 = vmul.f32 %v1976_v57, %v4413_v38  ;;  %v1977_v0 = vmul.f32 %v4421_v47, %v4421_v47  ;;  %v1979_v1 = vmul.f32 %v4424_v58, %v4424_v58 }
 0xf44   :  { %3592 = vtanh.f32 %v2038_v43  ;;  %v1994_v61 = vmul.f32 %v1978_v51, %v4416_v56  ;;  %v1980_v6 = vmul.f32 %v4429_v60, %v4429_v60  ;;  %v1982_v4 = vmul.f32 %v4432_v62, %v4432_v62 }
 0xf45   :  { %3594 = vtanh.f32 %v2037_v54  ;;  %v2008_v3 = vmul.f32 0.044715, %v1992_v63  ;;  %v1993_v59 = vmul.f32 %v1977_v0, %v4421_v47  ;;  %v1995_v7 = vmul.f32 %v1979_v1, %v4424_v58 }
 0xf46   :  { %3596 = vtanh.f32 %v2039_v55  ;;  %v2010_v8 = vmul.f32 0.044715, %v1994_v61  ;;  %v1996_v10 = vmul.f32 %v1980_v6, %v4429_v60  ;;  %v1998_v11 = vmul.f32 %v1982_v4, %v4432_v62 }
 0xf47   :  { %v2024_v12 = vadd.f32 %v2008_v3, %v4413_v38  ;;  %v2009_v30 = vmul.f32 0.044715, %v1993_v59  ;;  %v2011_v32 = vmul.f32 0.044715, %v1995_v7  ;;  %v4450_v14 = vadd.f32 %v1912_v39, %v4350_v21 }
 0xf48   :  { %v2026_v17 = vadd.f32 %v2010_v8, %v4416_v56  ;;  %v2012_v27 = vmul.f32 0.044715, %v1996_v10  ;;  %v2014_v29 = vmul.f32 0.044715, %v1998_v11  ;;  %v4454_v31 = vadd.f32 %v1965_v40, %v4354_v5 }
 0xf49   :  { %v3583_v9 = vpop.eup %3582  ;;  %v2040_v13 = vmul.f32 0.7978846, %v2024_v12  ;;  %v2025_v20 = vadd.f32 %v2009_v30, %v4421_v47  ;;  %v2027_v22 = vadd.f32 %v2011_v32, %v4424_v58  ;;  %v1981_v28 = vmul.f32 %v4450_v14, %v4450_v14 }
 0xf4a   :  { %v3585_v33 = vpop.eup %3584  ;;  %v2064_v44 = vadd.f32 1.0, %v3583_v9  ;;  %v2042_v21 = vmul.f32 0.7978846, %v2026_v17  ;;  %v2028_v39 = vadd.f32 %v2012_v27, %v4429_v60  ;;  %v2030_v45 = vadd.f32 %v2014_v29, %v4432_v62 }
 0xf4b   :  { %v3587_v25 = vpop.eup %3586  ;;  %v2066_v48 = vadd.f32 1.0, %v3585_v33  ;;  %3598 = vtanh.f32 %v2040_v13  ;;  %v2041_v5 = vmul.f32 0.7978846, %v2025_v20  ;;  %v2043_v40 = vmul.f32 0.7978846, %v2027_v22 }
 0xf4c   :  { %v3589_v50 = vpop.eup %3588  ;;  %v2080_v43 = vmul.f32 0.5, %v2064_v44  ;;  %3600 = vtanh.f32 %v2042_v21  ;;  %v2044_v54 = vmul.f32 0.7978846, %v2028_v39  ;;  %v2046_v55 = vmul.f32 0.7978846, %v2030_v45 }
 0xf4d   :  { %v3591_v57 = vpop.eup %3590  ;;  %v2082_v51 = vmul.f32 0.5, %v2066_v48  ;;  %3602 = vtanh.f32 %v2041_v5  ;;  %v1997_v63 = vmul.f32 %v1981_v28, %v4450_v14  ;;  %v1983_v0 = vmul.f32 %v4454_v31, %v4454_v31 }
 0xf4e   :  { %v3593_v1 = vpop.eup %3592  ;;  %v2096_v61 = vmul.f32 %v2080_v43, %v4357_v24  ;;  %v2068_v6 = vadd.f32 1.0, %v3591_v57  ;;  %3604 = vtanh.f32 %v2043_v40  ;;  %v2065_v4 = vadd.f32 1.0, %v3587_v25 }
 0xf4f   :  { %v3595_v3 = vpop.eup %3594  ;;  %v2098_v59 = vmul.f32 %v2082_v51, %v4360_v26  ;;  %v2070_v7 = vadd.f32 1.0, %v3593_v1  ;;  %3606 = vtanh.f32 %v2044_v54  ;;  %v2013_v8 = vmul.f32 0.044715, %v1997_v63 }
 0xf50   :  { %v3597_v10 = vpop.eup %3596  ;;  %v2084_v11 = vmul.f32 0.5, %v2068_v6  ;;  %3608 = vtanh.f32 %v2046_v55  ;;  %v1999_v12 = vmul.f32 %v1983_v0, %v4454_v31  ;;  %v2069_v30 = vadd.f32 1.0, %v3595_v3 }
 0xf51   :  { %v2086_v32 = vmul.f32 0.5, %v2070_v7  ;;  %v2029_v17 = vadd.f32 %v2013_v8, %v4450_v14  ;;  %v2081_v27 = vmul.f32 0.5, %v2065_v4  ;;  %v2067_v24 = vadd.f32 1.0, %v3589_v50 }
 0xf52   :  { %v2100_v29 = vmul.f32 %v2084_v11, %v4373_v34  ;;  %v2015_v9 = vmul.f32 0.044715, %v1999_v12  ;;  %v2085_v13 = vmul.f32 0.5, %v2069_v30  ;;  %v2071_v20 = vadd.f32 1.0, %v3597_v10 }
 0xf53   :  { %v2102_v26 = vmul.f32 %v2086_v32, %v4376_v46  ;;  %v2045_v22 = vmul.f32 0.7978846, %v2029_v17  ;;  %v2097_v28 = vmul.f32 %v2081_v27, %v4363_v35  ;;  %v2083_v33 = vmul.f32 0.5, %v2067_v24 }
 0xf54   :  { %v2112_v44 = vpack.c.bf16 %v2100_v29, %v2096_v61  ;;  %v2031_v21 = vadd.f32 %v2015_v9, %v4454_v31  ;;  %v2101_v39 = vmul.f32 %v2085_v13, %v4383_v23  ;;  %v2087_v45 = vmul.f32 0.5, %v2071_v20 }
 0xf55   :  { %v3599_v25 = vpop.eup %3598  ;;  %v2114_v48 = vpack.c.bf16 %v2102_v26, %v2098_v59  ;;  %3610 = vtanh.f32 %v2045_v22  ;;  %v2099_v34 = vmul.f32 %v2083_v33, %v4366_v37 }
 0xf56   :  { %v3601_v5 = vpop.eup %3600  ;;  %v2047_v40 = vmul.f32 0.7978846, %v2031_v21  ;;  %v2113_v50 = vpack.c.bf16 %v2101_v39, %v2097_v28  ;;  %v2103_v46 = vmul.f32 %v2087_v45, %v4386_v36  ;;  %v2072_v43 = vadd.f32 1.0, %v3599_v25 }
 0xf57   :  { %v3603_v54 = vpop.eup %3602  ;;  %v2074_v35 = vadd.f32 1.0, %v3601_v5 }
 0xf58   :  { %v3605_v55 = vpop.eup %3604  ;;  %3612 = vtanh.f32 %v2047_v40  ;;  %2415 = vmatprep.mubr.bf16.mxu0 %v2113_v50  ;;  %v2115_v57 = vpack.c.bf16 %v2103_v46, %v2099_v34  ;;  %v2088_v0 = vmul.f32 0.5, %v2072_v43  ;;  %v2073_v61 = vadd.f32 1.0, %v3603_v54 }
 0xf59   :  { %v3607_v51 = vpop.eup %3606  ;;  %2416 = vmatmul.mubr.bf16.vlgmr.msra.gmra.mrb[52].mxu0 %v2112_v44  ;;  %v2090_v1 = vmul.f32 0.5, %v2074_v35  ;;  %v2075_v7 = vadd.f32 1.0, %v3605_v55 }
 0xf5a   :  { %v3609_v23 = vpop.eup %3608  ;;  %2464 = vmatprep.mubr.bf16.mxu1 %v2115_v57  ;;  %v2076_v63 = vadd.f32 1.0, %v3607_v51  ;;  %v2104_v36 = vmul.f32 %v2088_v0, %v4413_v38  ;;  %v2089_v12 = vmul.f32 0.5, %v2073_v61 }
 0xf5b   :  { %2465 = vmatmul.mubr.bf16.vlgmr.msra.gmra.mrb[44].mxu1 %v2114_v48  ;;  %v2078_v37 = vadd.f32 1.0, %v3609_v23  ;;  %v2106_v8 = vmul.f32 %v2090_v1, %v4416_v56  ;;  %v2091_v29 = vmul.f32 0.5, %v2075_v7  ;;  %v3456_v7 = vld [vmem:[%s4687_s13 + $0x4] ss:$16 sps:$4 sm:$0xff]  }
 0xf5c   :  { %v2092_v6 = vmul.f32 0.5, %v2076_v63  ;;  %v2105_v9 = vmul.f32 %v2089_v12, %v4421_v47  ;;  %v2977_v47 = vld [vmem:[%s4686_s10] ss:$0 sm:$0xff]  ;;  %2767 = vmatprep.subr.bf16.mxu0 %v3456_v7  ;;  %v3465_v12 = vld [vmem:[%s4687_s13 + $0x2c] ss:$16 sps:$4 sm:$0xff]  }
 0xf5d   :  { %v2094_v4 = vmul.f32 0.5, %v2078_v37  ;;  %v2107_v20 = vmul.f32 %v2091_v29, %v4424_v58 }
 0xf5e   :  { %v2108_v3 = vmul.f32 %v2092_v6, %v4429_v60 }
 0xf5f   :  { %v3611_v59 = vpop.eup %3610  ;;  %v2110_v10 = vmul.f32 %v2094_v4, %v4432_v62 }
 0xf60   :  { %v2077_v11 = vadd.f32 1.0, %v3611_v59  ;;  %v2116_v30 = vpack.c.bf16 %v2108_v3, %v2104_v36  ;;  %v3454_v59 = vld [vmem:[%s4687_s13] ss:$16 sps:$4 sm:$0xff]  }
 0xf61   :  { %v2118_v32 = vpack.c.bf16 %v2110_v10, %v2106_v8  ;;  %v3457_v8 = vld [vmem:[%s4687_s13 + $0x8] ss:$16 sps:$4 sm:$0xff]   ;;  %2768 = vmatpush1.bf16.msra.mxu0 %v3454_v59  ;;  %v3460_v10 = vld [vmem:[%s4687_s13 + $0x20] ss:$16 sps:$4 sm:$0xff]  }
 0xf62   :  { %v3613_v17 = vpop.eup %3612  ;;  %v2093_v27 = vmul.f32 0.5, %v2077_v11  ;;  %v3463_v11 = vld [vmem:[%s4687_s13 + $0x28] ss:$16 sps:$4 sm:$0xff]  }
 0xf63   :  { %v2079_v24 = vadd.f32 1.0, %v3613_v17 }
 0xf64   :  { %v2109_v38 = vmul.f32 %v2093_v27, %v4450_v14 }
 0xf65   :  { %v2095_v13 = vmul.f32 0.5, %v2079_v24 }
 0xf66   :  { %v2117_v60 = vpack.c.bf16 %v2109_v38, %v2105_v9 }
 0xf67   :  { %v2111_v56 = vmul.f32 %v2095_v13, %v4454_v31 }
 0xf68   :  { %2423 = vmatprep.mubr.bf16.mxu0 %v2117_v60 }
 0xf69   :  { %v2119_v62 = vpack.c.bf16 %v2111_v56, %v2107_v20  ;;  %2424 = vmatmul.mubr.bf16.gmra.mrb[56].mxu0 %v2116_v30 }
 0xf6a   :  { %2799 = vmatprep.mubr.bf16.mxu0 %v3622_v41 }
 0xf6b   :  { %2472 = vmatprep.mubr.bf16.mxu1 %v2119_v62 }
 0xf6c   :  { %2473 = vmatmul.mubr.bf16.gmra.mrb[48].mxu1 %v2118_v32 }
 0xf6d   :  { %2852 = vmatprep.mubr.bf16.mxu1 %v3622_v41 }
0x102c   :  { %v3121_v26 = vpop.f32.mrb[52].mxu0 }
0x102d   :  { %v3122_v14 = vpop.f32.mrb[53].mxu0 }
0x102e   :  { %v3149_v22 = vpop.f32.mrb[44].mxu1  ;;  %v3123_v28 = vadd.f32 %v3122_v14, %v3121_v26  ;;  %v3124_v58 = vpop.f32.mrb[54].mxu0 }
0x102f   :  { %v3150_v33 = vpop.f32.mrb[45].mxu1  ;;  %v3125_v31 = vpop.f32.mrb[55].mxu0 }
0x1030   :  { %v2418_v44 = vadd.f32 %v3123_v28, %v2977_v47  ;;  %v3151_v21 = vadd.f32 %v3150_v33, %v3149_v22  ;;  %v3152_v39 = vpop.f32.mrb[46].mxu1  ;;  %v3126_v45 = vadd.f32 %v3125_v31, %v3124_v58  ;;  %v3468_v22 = vld [vmem:[%s4687_s13 + $0x44] ss:$16 sps:$4 sm:$0xff]   ;;  %v3471_v28 = vld [vmem:[%s4687_s13 + $0x4c] ss:$16 sps:$4 sm:$0xff]  }
0x1031   :  { %v3153_v25 = vpop.f32.mrb[47].mxu1  ;;  %v3466_v58 = vld [vmem:[%s4687_s13 + $0x40] ss:$16 sps:$4 sm:$0xff]   ;;  %v3469_v33 = vld [vmem:[%s4687_s13 + $0x48] ss:$16 sps:$4 sm:$0xff]  }
0x1032   :  { %v2467_v48 = vadd.f32 %v3151_v21, %v2418_v44  ;;  %v2421_v34 = vadd.f32 %v3126_v45, %v2977_v47  ;;  %v3154_v5 = vadd.f32 %v3153_v25, %v3152_v39  ;;  %v3474_v31 = vld [vmem:[%s4687_s13 + $0x64] ss:$16 sps:$4 sm:$0xff]   ;;  %v3477_v44 = vld [vmem:[%s4687_s13 + $0x6c] ss:$16 sps:$4 sm:$0xff]   ;;  %v3472_v21 = vld [vmem:[%s4687_s13 + $0x60] ss:$16 sps:$4 sm:$0xff]  }
0x1033   :  { %v3475_v39 = vld [vmem:[%s4687_s13 + $0x68] ss:$16 sps:$4 sm:$0xff]   ;;  %v3480_v45 = vld [vmem:[%s4687_s13 + $0x84] ss:$16 sps:$4 sm:$0xff]   ;;  %v3483_v25 = vld [vmem:[%s4687_s13 + $0x8c] ss:$16 sps:$4 sm:$0xff]  }
0x1034   :  { %v2470_v40 = vadd.f32 %v3154_v5, %v2421_v34  ;;  %v2481_v50 = vadd.f32 %v2467_v48, %v4094_v16  ;;  %v3478_v48 = vld [vmem:[%s4687_s13 + $0x80] ss:$16 sps:$4 sm:$0xff]   ;;  %v3481_v34 = vld [vmem:[%s4687_s13 + $0x88] ss:$16 sps:$4 sm:$0xff]   ;;  %v3486_v5 = vld [vmem:[%s4687_s13 + $0xa4] ss:$16 sps:$4 sm:$0xff]  }
0x1036   :  { %2487 = vadd.xlane.f32.xlu0 %v2481_v50  ;;  %v2482_v46 = vadd.f32 %v2470_v40, %v4097_v53  ;;  %v3489_v40 = vld [vmem:[%s4687_s13 + $0xac] ss:$16 sps:$4 sm:$0xff]  }
0x1038   :  { %2489 = vadd.xlane.f32.xlu1 %v2482_v46 }
0x103c   :  { %v3127_v43 = vpop.f32.mrb[56].mxu0 }
0x103d   :  { %v3128_v54 = vpop.f32.mrb[57].mxu0 }
0x103e   :  { %v3129_v35 = vadd.f32 %v3128_v54, %v3127_v43  ;;  %v3130_v55 = vpop.f32.mrb[58].mxu0  ;;  %v3492_v43 = vld [vmem:[%s4687_s13 + $0xc4] ss:$16 sps:$4 sm:$0xff]   ;;  %v3495_v54 = vld [vmem:[%s4687_s13 + $0xcc] ss:$16 sps:$4 sm:$0xff]  }
0x103f   :  { %v3155_v57 = vpop.f32.mrb[48].mxu1  ;;  %v3131_v51 = vpop.f32.mrb[59].mxu0 }
0x1040   :  { %v2426_v23 = vadd.f32 %v3129_v35, %v2977_v47  ;;  %v3156_v63 = vpop.f32.mrb[49].mxu1  ;;  %v3132_v0 = vadd.f32 %v3131_v51, %v3130_v55  ;;  %v3490_v35 = vld [vmem:[%s4687_s13 + $0xc0] ss:$16 sps:$4 sm:$0xff]   ;;  %v3493_v55 = vld [vmem:[%s4687_s13 + $0xc8] ss:$16 sps:$4 sm:$0xff]  }
0x1041   :  { %v3157_v37 = vadd.f32 %v3156_v63, %v3155_v57  ;;  %v3158_v1 = vpop.f32.mrb[50].mxu1  ;;  %v3498_v57 = vld [vmem:[%s4687_s13 + $0xe4] ss:$16 sps:$4 sm:$0xff]   ;;  %v3501_v51 = vld [vmem:[%s4687_s13 + $0xec] ss:$16 sps:$4 sm:$0xff]  }
0x1042   :  { %v2429_v61 = vadd.f32 %v3132_v0, %v2977_v47  ;;  %v3159_v6 = vpop.f32.mrb[51].mxu1  ;;  %v3499_v63 = vld [vmem:[%s4687_s13 + $0xe8] ss:$16 sps:$4 sm:$0xff]  }
0x1043   :  { %v2475_v4 = vadd.f32 %v3157_v37, %v2426_v23  ;;  %v3160_v36 = vadd.f32 %v3159_v6, %v3158_v1  ;;  %v3496_v23 = vld [vmem:[%s4687_s13 + $0xe0] ss:$16 sps:$4 sm:$0xff]  }
0x1045   :  { %v2478_v16 = vadd.f32 %v3160_v36, %v2429_v61  ;;  %v2483_v3 = vadd.f32 %v2475_v4, %v4101_v19  ;;  %v3459_v19 = vld [vmem:[%s4687_s13 + $0xc] ss:$16 sps:$4 sm:$0xff]  }
0x1046   :  { %2820 = vmatprep.subr.bf16.mxu1 %v3459_v19 }
0x1047   :  { %2491 = vadd.xlane.f32.xlu0 %v2483_v3  ;;  %v2484_v53 = vadd.f32 %v2478_v16, %v4106_v15  ;;  %v3462_v15 = vld [vmem:[%s4687_s13 + $0x24] ss:$16 sps:$4 sm:$0xff]   ;;  %2821 = vmatpush1.bf16.msra.mxu1 %v3457_v8  ;;  %v3010_v16 = vld [vmem:[%s4688_s11] ss:$0 sm:$0xff] }
0x1048   :  { %2769 = vmatprep.subr.bf16.mxu0 %v3462_v15  ;;  %2822 = vmatprep.subr.bf16.mxu1 %v3465_v12 }
0x1049   :  { %2493 = vadd.xlane.f32.xlu1 %v2484_v53  ;;  %2770 = vmatpush1.bf16.msra.mxu0 %v3460_v10  ;;  %v3011_v10 = vld [vmem:[%s4689_s12] ss:$0 sm:$0xff] }
0x104a   :  { %2771 = vmatprep.subr.bf16.mxu0 %v3468_v22  ;;  %v2585_v22 = vld [vmem:[%s4690_s14] sm:$0xf] }
0x104b   :  { %2823 = vmatpush1.bf16.msra.mxu1 %v3463_v11 }
0x104c   :  { %2824 = vmatprep.subr.bf16.mxu1 %v3471_v28  ;;  %v2602_v28 = vrot.slane %v2585_v22, %v1696_v2 }
0x104d   :  { %2772 = vmatpush1.bf16.msra.mxu0 %v3466_v58 }
0x104e   :  { %2773 = vmatprep.subr.bf16.mxu0 %v3474_v31 }
0x104f   :  { %2825 = vmatpush1.bf16.msra.mxu1 %v3469_v33 }
0x1050   :  { %2826 = vmatprep.subr.bf16.mxu1 %v3477_v44 }
0x1051   :  { %2774 = vmatpush1.bf16.msra.mxu0 %v3472_v21 }
0x1052   :  { %2775 = vmatprep.subr.bf16.mxu0 %v3480_v45 }
0x1053   :  { %2827 = vmatpush1.bf16.msra.mxu1 %v3475_v39 }
0x1054   :  { %2828 = vmatprep.subr.bf16.mxu1 %v3483_v25 }
0x1055   :  { %2776 = vmatpush1.bf16.msra.mxu0 %v3478_v48 }
0x1056   :  { %2777 = vmatprep.subr.bf16.mxu0 %v3486_v5 }
0x1057   :  { %2829 = vmatpush1.bf16.msra.mxu1 %v3481_v34 }
0x1058   :  { %2830 = vmatprep.subr.bf16.mxu1 %v3489_v40 }
0x10c3   :  { %v2488_v30 = vpop.xlane.xlu0 %2487 }
0x10c4   :  { %v2495_v32 = vmul.f32 0.0078125, %v2488_v30 }
0x10c5   :  { %v2490_v17 = vpop.xlane.xlu1 %2489 }
0x10c6   :  { %v4517_v27 = vsub.f32 %v2481_v50, %v2495_v32  ;;  %v2496_v24 = vmul.f32 0.0078125, %v2490_v17  ;;  %v3484_v50 = vld [vmem:[%s4687_s13 + $0xa0] ss:$16 sps:$4 sm:$0xff]  }
0x10c7   :  { %2778 = vmatpush1.bf16.msra.mxu0 %v3484_v50 }
0x10c8   :  { %v4519_v29 = vsub.f32 %v2482_v46, %v2496_v24  ;;  %v2503_v9 = vmul.f32 %v4517_v27, %v4517_v27  ;;  %v3487_v46 = vld [vmem:[%s4687_s13 + $0xa8] ss:$16 sps:$4 sm:$0xff]   ;;  %2779 = vmatprep.subr.bf16.mxu0 %v3492_v43 }
0x10c9   :  { %2831 = vmatpush1.bf16.msra.mxu1 %v3487_v46 }
0x10ca   :  { %2507 = vadd.xlane.f32.xlu0 %v2503_v9  ;;  %v2504_v38 = vmul.f32 %v4519_v29, %v4519_v29  ;;  %2832 = vmatprep.subr.bf16.mxu1 %v3495_v54 }
0x10cb   :  { %2780 = vmatpush1.bf16.msra.mxu0 %v3490_v35 }
0x10cc   :  { %2509 = vadd.xlane.f32.xlu1 %v2504_v38  ;;  %2781 = vmatprep.subr.bf16.mxu0 %v3498_v57 }
0x10cd   :  { %2833 = vmatpush1.bf16.msra.mxu1 %v3493_v55 }
0x10ce   :  { %2834 = vmatprep.subr.bf16.mxu1 %v3501_v51 }
0x10cf   :  { %2782 = vmatpush1.bf16.msra.mxu0 %v3496_v23 }
0x10d1   :  { %2835 = vmatpush1.bf16.msra.mxu1 %v3499_v63 }
0x10d4   :  { %v2492_v13 = vpop.xlane.xlu0 %2491 }
0x10d5   :  { %v2497_v60 = vmul.f32 0.0078125, %v2492_v13 }
0x10d6   :  { %v2494_v20 = vpop.xlane.xlu1 %2493 }
0x10d7   :  { %v4525_v56 = vsub.f32 %v2483_v3, %v2497_v60  ;;  %v2498_v62 = vmul.f32 0.0078125, %v2494_v20 }
0x10d9   :  { %v4527_v26 = vsub.f32 %v2484_v53, %v2498_v62  ;;  %v2505_v47 = vmul.f32 %v4525_v56, %v4525_v56 }
0x10db   :  { %2511 = vadd.xlane.f32.xlu0 %v2505_v47  ;;  %v2506_v14 = vmul.f32 %v4527_v26, %v4527_v26 }
0x10dd   :  { %2513 = vadd.xlane.f32.xlu1 %v2506_v14 }
0x1157   :  { %v2508_v0 = vpop.xlane.xlu0 %2507 }
0x1158   :  { %v2515_v37 = vmul.f32 0.0078125, %v2508_v0 }
0x1159   :  { %v2510_v1 = vpop.xlane.xlu1 %2509 }
0x115a   :  { %v2519_v61 = vadd.f32 1e-05, %v2515_v37  ;;  %v2516_v6 = vmul.f32 0.0078125, %v2510_v1 }
0x115c   :  { %3614 = vrsqrt.f32 %v2519_v61  ;;  %v2520_v4 = vadd.f32 1e-05, %v2516_v6 }
0x115e   :  { %3616 = vrsqrt.f32 %v2520_v4 }
0x1166   :  { %v3615_v36 = vpop.eup %3614 }
0x1167   :  { %v2527_v3 = vmul.f32 %v3615_v36, %v4517_v27 }
0x1168   :  { %v3617_v53 = vpop.eup %3616  ;;  %v2512_v59 = vpop.xlane.xlu0 %2511 }
0x1169   :  { %v2537_v7 = vmul.f32 %v3010_v16, %v2527_v3  ;;  %v2528_v8 = vmul.f32 %v3617_v53, %v4519_v29  ;;  %v2517_v19 = vmul.f32 0.0078125, %v2512_v59 }
0x116a   :  { %v2514_v15 = vpop.xlane.xlu1 %2513 }
0x116b   :  { %v2538_v11 = vmul.f32 %v3010_v16, %v2528_v8  ;;  %v2521_v12 = vadd.f32 1e-05, %v2517_v19  ;;  %v2518_v30 = vmul.f32 0.0078125, %v2514_v15  ;;  %v2547_v17 = vadd.f32 %v3011_v10, %v2537_v7 }
0x116d   :  { %3618 = vrsqrt.f32 %v2521_v12  ;;  %v2522_v32 = vadd.f32 1e-05, %v2518_v30  ;;  %v2548_v24 = vadd.f32 %v3011_v10, %v2538_v11 }
0x116f   :  { %3620 = vrsqrt.f32 %v2522_v32  ;;  %v2551_v27 = vpack.c.bf16 %v2548_v24, %v2547_v17 }
0x1171   :  { %2800 = vmatmul.mubr.bf16.vlgmr.msra.gmra.mrb[60].mxu0 %v2551_v27  ;;  %2853 = vmatmul.mubr.bf16.vlgmr.msra.gmra.mrb[52].mxu1 %v2551_v27 }
0x1172   :  { %2809 = vmatprep.mubr.bf16.mxu0 %v3622_v41  ;;  %2862 = vmatprep.mubr.bf16.mxu1 %v3622_v41  ;;  %v2590_v41 = vrot.slane %v2585_v22, %v1684_v18 }
0x1177   :  { %v3619_v29 = vpop.eup %3618 }
0x1178   :  { %v2529_v9 = vmul.f32 %v3619_v29, %v4525_v56  ;;  %v2598_v56 = vrot.slane %v2585_v22, %v1692_v49 }
0x1179   :  { %v3621_v38 = vpop.eup %3620 }
0x117a   :  { %v2530_v13 = vmul.f32 %v3621_v38, %v4527_v26  ;;  %v2539_v60 = vmul.f32 %v3010_v16, %v2529_v9  ;;  %v2594_v26 = vrot.slane %v2585_v22, %v1688_v52 }
0x117c   :  { %v2540_v20 = vmul.f32 %v3010_v16, %v2530_v13  ;;  %v2549_v62 = vadd.f32 %v3011_v10, %v2539_v60 }
0x117e   :  { %v2550_v47 = vadd.f32 %v3011_v10, %v2540_v20 }
0x1180   :  { %v2552_v14 = vpack.c.bf16 %v2550_v47, %v2549_v62 }
0x1182   :  { %2810 = vmatmul.mubr.bf16.gmra.mrb[64].mxu0 %v2552_v14  ;;  %2863 = vmatmul.mubr.bf16.gmra.mrb[56].mxu1 %v2552_v14 }
0x1244   :  { %v2801_v58 = vpop.f32.mrb[60].mxu0  ;;  %v2854_v33 = vpop.f32.mrb[52].mxu1 }
0x1245   :  { %v2802_v31 = vadd.f32 %v2801_v58, %v2590_v41  ;;  %v2855_v44 = vadd.f32 %v2854_v33, %v2598_v56  ;;  %v2803_v21 = vpop.f32.mrb[61].mxu0  ;;  %v2856_v39 = vpop.f32.mrb[53].mxu1 }
0x1246   :  { %v2804_v45 = vadd.f32 %v2803_v21, %v2594_v26  ;;  %v2857_v25 = vadd.f32 %v2856_v39, %v2602_v28  ;;  %v2805_v48 = vpop.f32.mrb[62].mxu0  ;;  %v2858_v34 = vpop.f32.mrb[54].mxu1 }
0x1247   :  { %2873 = vst [vmem:[%s4691_s15] sm:$0xff] %v2802_v31  ;;  %2875 = vst [vmem:[%s4691_s15 + $0x10] sm:$0xff] %v2855_v44  ;;  %v2806_v42 = vadd.f32 %v2805_v48, %v2590_v41  ;;  %v2859_v18 = vadd.f32 %v2858_v34, %v2598_v56  ;;  %v2807_v49 = vpop.f32.mrb[63].mxu0  ;;  %v2860_v52 = vpop.f32.mrb[55].mxu1 }
0x1248   :  { %2874 = vst [vmem:[%s4691_s15 + $0x8] sm:$0xff] %v2804_v45  ;;  %2876 = vst [vmem:[%s4691_s15 + $0x18] sm:$0xff] %v2857_v25  ;;  %v2808_v2 = vadd.f32 %v2807_v49, %v2594_v26  ;;  %v2861_v5 = vadd.f32 %v2860_v52, %v2602_v28 }
0x1249   :  { %2877 = vst [vmem:[%s4691_s15 + $0x20] sm:$0xff] %v2806_v42  ;;  %2879 = vst [vmem:[%s4691_s15 + $0x30] sm:$0xff] %v2859_v18 }
0x124a   :  { %2878 = vst [vmem:[%s4691_s15 + $0x28] sm:$0xff] %v2808_v2  ;;  %2880 = vst [vmem:[%s4691_s15 + $0x38] sm:$0xff] %v2861_v5 }
0x1255   :  { %v2811_v40 = vpop.f32.mrb[64].mxu0  ;;  %v2864_v50 = vpop.f32.mrb[56].mxu1 }
0x1256   :  { %v2812_v46 = vadd.f32 %v2811_v40, %v2590_v41  ;;  %v2865_v43 = vadd.f32 %v2864_v50, %v2598_v56  ;;  %v2813_v54 = vpop.f32.mrb[65].mxu0  ;;  %v2866_v35 = vpop.f32.mrb[57].mxu1 }
0x1257   :  { %v2814_v55 = vadd.f32 %v2813_v54, %v2594_v26  ;;  %v2867_v57 = vadd.f32 %v2866_v35, %v2602_v28  ;;  %v2815_v51 = vpop.f32.mrb[66].mxu0  ;;  %v2868_v23 = vpop.f32.mrb[58].mxu1 }
0x1258   :  { %2881 = vst [vmem:[%s4691_s15 + $0x40] sm:$0xff] %v2812_v46  ;;  %2883 = vst [vmem:[%s4691_s15 + $0x50] sm:$0xff] %v2865_v43  ;;  %v2816_v63 = vadd.f32 %v2815_v51, %v2590_v41  ;;  %v2869_v0 = vadd.f32 %v2868_v23, %v2598_v56  ;;  %v2817_v37 = vpop.f32.mrb[67].mxu0  ;;  %v2870_v1 = vpop.f32.mrb[59].mxu1 }
0x1259   :  { %2882 = vst [vmem:[%s4691_s15 + $0x48] sm:$0xff] %v2814_v55  ;;  %2884 = vst [vmem:[%s4691_s15 + $0x58] sm:$0xff] %v2867_v57  ;;  %v2818_v61 = vadd.f32 %v2817_v37, %v2594_v26  ;;  %v2871_v6 = vadd.f32 %v2870_v1, %v2602_v28 }
0x125a   :  { %2885 = vst [vmem:[%s4691_s15 + $0x60] sm:$0xff] %v2816_v63  ;;  %2887 = vst [vmem:[%s4691_s15 + $0x70] sm:$0xff] %v2869_v0 }
0x125b   :  { %2886 = vst [vmem:[%s4691_s15 + $0x68] sm:$0xff] %v2818_v61  ;;  %2888 = vst [vmem:[%s4691_s15 + $0x78] sm:$0xff] %v2871_v6 }

</bundles_post_ra>
